<compile_context>
chip_gen: v6e
topology: v6e:2x2x1
jax: 0.10.0
libtpu: 0.0.40
codegen_flags: <defaults>
</compile_context>

<pallas_src>
import functools

import jax
import jax.numpy as jnp
from jax import lax
from jax.experimental import pallas as pl
from jax.experimental.pallas import tpu as pltpu


# ------------------------------- model config -------------------------------

EMBED_DIM = 32           # output_dim
IMAGE_RESOLUTION = 16
PATCH_SIZE = 4
VISION_WIDTH = 32        # config.hidden_size
NUM_HEADS = 4
NUM_LAYERS = 2
FFN_DIM = 64
BATCH = 2

NUM_PATCHES = (IMAGE_RESOLUTION // PATCH_SIZE) ** 2
SEQ_LEN = NUM_PATCHES + 1                 # 16 patches + CLS = 17
PATCH_DIM = 3 * PATCH_SIZE * PATCH_SIZE   # 48

_LN_EPS = 1e-5
_MXU_DTYPE = jnp.bfloat16                 # matmul operands; accumulation fp32


# ------------------------------- fused kernel --------------------------------

def _vit_tower_kernel(
    patch_ref, convw_ref, poscls_ref,
    lnpre_g_ref, lnpre_b_ref,
    ln1_g_ref, ln1_b_ref, wqkv_ref, bqkv_ref, wo_ref, bo_ref,
    ln2_g_ref, ln2_b_ref, w1_ref, b1_ref, w2_ref, b2_ref,
    lnpost_g_ref, lnpost_b_ref, proj_ref,
    out_ref,
    *, width, heads, layers):
    """One image per grid step; the whole tower stays in vregs (no scratch)."""
    dh = width // heads

    def ln(x, g, b):                      # fp32 LayerNorm (fp32 subclass semantics)
        mu = jnp.mean(x, axis=-1, keepdims=True)
        xc = x - mu
        var = jnp.mean(xc * xc, axis=-1, keepdims=True)
        return xc * lax.rsqrt(var + _LN_EPS) * g + b

    def mm(x_bf16, w):                    # bf16 MXU operands, fp32 accumulation
        return jnp.dot(x_bf16, w, preferred_element_type=jnp.float32)

    # --- patch embedding + (CLS + positional) embedding: one matmul, one add.
    # Row 0 of the patch slab is all-zero (prepended in the wrapper) and row 0
    # of poscls already holds class_embedding + positional_embedding[0].
    x = mm(patch_ref[0], convw_ref[...]) + poscls_ref[...]        # [S, W] fp32

    # --- ln_pre ---
    x = ln(x, lnpre_g_ref[...], lnpre_b_ref[...])

    # --- pre-LN transformer encoder layers ---
    # TODO(synk): LeanTransformer internals unspecified; standard pre-LN block
    # (unmasked MHSA + QuickGELU MLP) assumed for the vision tower.
    # TODO(synk): at real CLIP width/depth, stream one layer at a time (grid
    # axis over L or manual double-buffered DMA) instead of keeping all
    # stacked [L, ...] weights VMEM-resident.
    def layer_body(l, x):
        # fused QKV projection; 1/sqrt(dh) pre-folded into the Q columns/bias.
        h = ln(x, ln1_g_ref[l], ln1_b_ref[l]).astype(_MXU_DTYPE)
        qkv = mm(h, wqkv_ref[l]) + bqkv_ref[l]                    # [S, 3W] fp32
        qkv_b = qkv.astype(_MXU_DTYPE)                            # cast once

        # attention: head outputs stay in registers, concatenated lane-dense.
        head_outs = []
        for hd in range(heads):
            c = hd * dh
            qh = qkv_b[:, c:c + dh]
            kh = qkv_b[:, width + c:width + c + dh]
            vh = qkv_b[:, 2 * width + c:2 * width + c + dh]
            s = lax.dot_general(                                  # q @ k^T
                qh, kh, (((1,), (1,)), ((), ())),
                preferred_element_type=jnp.float32)               # [S, S] fp32
            s = s - jnp.max(s, axis=-1, keepdims=True)
            p = jnp.exp(s)
            p = p * pl.reciprocal(jnp.sum(p, axis=-1, keepdims=True),
                                  approx=True)
            head_outs.append(mm(p.astype(_MXU_DTYPE), vh))        # [S, dh] fp32
        attn = jnp.concatenate(head_outs, axis=-1)                # [S, W] fp32

        x = x + mm(attn.astype(_MXU_DTYPE), wo_ref[l]) + bo_ref[l]

        # MLP with QuickGELU (x * sigmoid(1.702 x)) -- OpenAI CLIP activation,
        # lowers to the EUP transcendental slot.
        h = ln(x, ln2_g_ref[l], ln2_b_ref[l]).astype(_MXU_DTYPE)
        h = mm(h, w1_ref[l]) + b1_ref[l]
        h = h * jax.nn.sigmoid(1.702 * h)
        x = x + mm(h.astype(_MXU_DTYPE), w2_ref[l]) + b2_ref[l]
        return x

    x = lax.fori_loop(0, layers, layer_body, x)

    # --- ln_post on the CLS token + output projection ---
    cls_tok = ln(x[0:1, :], lnpost_g_ref[...], lnpost_b_ref[...])  # [1, W]
    out = mm(cls_tok.astype(_MXU_DTYPE), proj_ref[...])            # [1, E]
    out_ref[0] = out.astype(out_ref.dtype)


# ------------------------------ forward wrapper -------------------------------

@jax.jit
def visual_transformer_forward(image, packed):
    # image: [B, 3, H, W] (NCHW, like PyTorch)
    B, C, H, W_img = image.shape
    P = PATCH_SIZE
    gh, gw = H // P, W_img // P
    S = gh * gw + 1
    W = VISION_WIDTH
    F = FFN_DIM
    E = EMBED_DIM
    L = NUM_LAYERS
    CPP = C * P * P

    # conv(kernel=stride=P, bias=False) == patch extraction (XLA glue) + matmul.
    patches = image.reshape(B, C, gh, P, gw, P).transpose(0, 2, 4, 1, 3, 5)
    patches = patches.reshape(B, gh * gw, CPP)
    # Prepend one zero row per image: after the patch-embedding matmul it is
    # the (all-zero) CLS position, so the kernel needs no masked row writes.
    patches = jnp.concatenate(
        [jnp.zeros((B, 1, CPP), patches.dtype), patches], axis=1)  # [B, S, CPP]
    patches = patches.astype(_MXU_DTYPE)

    kern = functools.partial(
        _vit_tower_kernel, width=W, heads=NUM_HEADS, layers=L)

    def full(shape):
        nd = len(shape)
        return pl.BlockSpec(shape, lambda b, nd=nd: (0,) * nd)

    # Advisory cost estimate for the XLA scheduler.
    flops = B * (
        2 * S * CPP * W
        + L * (2 * S * W * (3 * W)          # qkv projection
               + 2 * (2 * S * S * W)        # scores + p@v over all heads
               + 2 * S * W * W              # output projection
               + 2 * S * W * F + 2 * S * F * W)   # mlp
        + 2 * W * E)
    transcendentals = B * L * (NUM_HEADS * S * S + S * F)
    bytes_accessed = (int(patches.size) * patches.dtype.itemsize
                      + sum(int(v.size) * v.dtype.itemsize
                            for v in packed.values())
                      + B * E * 4)

    out = pl.pallas_call(
        kern,
        grid=(B,),
        out_shape=jax.ShapeDtypeStruct((B, 1, E), jnp.float32),
        in_specs=[
            pl.BlockSpec((1, S, CPP), lambda b: (b, 0, 0)),   # per-image patches
            full((CPP, W)),                                   # conv_w
            full((S, W)),                                     # pos (+ cls in row 0)
            full((1, W)), full((1, W)),                       # ln_pre
            full((L, 1, W)), full((L, 1, W)),                 # ln1
            full((L, W, 3 * W)), full((L, 1, 3 * W)),         # wqkv, bqkv
            full((L, W, W)), full((L, 1, W)),                 # wo, bo
            full((L, 1, W)), full((L, 1, W)),                 # ln2
            full((L, W, F)), full((L, 1, F)),                 # w1, b1
            full((L, F, W)), full((L, 1, W)),                 # w2, b2
            full((1, W)), full((1, W)),                       # ln_post
            full((W, E)),                                     # proj
        ],
        out_specs=pl.BlockSpec((1, 1, E), lambda b: (b, 0, 0)),
        compiler_params=pltpu.CompilerParams(
            dimension_semantics=("parallel",),   # batch shards over v7x's 2 TCs
            vmem_limit_bytes=32 * 1024 * 1024),
        cost_estimate=pl.CostEstimate(
            flops=int(flops), transcendentals=int(transcendentals),
            bytes_accessed=int(bytes_accessed)),
    )(patches, packed["conv_w"], packed["poscls"],
      packed["lnpre_g"], packed["lnpre_b"],
      packed["ln1_g"], packed["ln1_b"], packed["wqkv"], packed["bqkv"],
      packed["wo"], packed["bo"], packed["ln2_g"], packed["ln2_b"],
      packed["w1"], packed["b1"], packed["w2"], packed["b2"],
      packed["lnpost_g"], packed["lnpost_b"], packed["proj"])
    return out[:, 0, :]


# ----------------------------- parameter handling -----------------------------

def init_visual_params(key):
    f32 = jnp.float32
    width = VISION_WIDTH
    scale = width ** -0.5
    keys = jax.random.split(key, 4 + NUM_LAYERS)

    def layer(k):
        ks = jax.random.split(k, 6)
        std = 0.02
        return {
            "ln1_g": jnp.ones((width,), f32), "ln1_b": jnp.zeros((width,), f32),
            "wq": std * jax.random.normal(ks[0], (width, width), f32),
            "bq": jnp.zeros((width,), f32),
            "wk": std * jax.random.normal(ks[1], (width, width), f32),
            "bk": jnp.zeros((width,), f32),
            "wv": std * jax.random.normal(ks[2], (width, width), f32),
            "bv": jnp.zeros((width,), f32),
            "wo": std * jax.random.normal(ks[3], (width, width), f32),
            "bo": jnp.zeros((width,), f32),
            "ln2_g": jnp.ones((width,), f32), "ln2_b": jnp.zeros((width,), f32),
            "w1": std * jax.random.normal(ks[4], (width, FFN_DIM), f32),
            "b1": jnp.zeros((FFN_DIM,), f32),
            "w2": std * jax.random.normal(ks[5], (FFN_DIM, width), f32),
            "b2": jnp.zeros((width,), f32),
        }

    return {
        "conv_w": scale * jax.random.normal(
            keys[0], (width, 3, PATCH_SIZE, PATCH_SIZE), f32),
        "class_embedding": scale * jax.random.normal(keys[1], (width,), f32),
        "positional_embedding": scale * jax.random.normal(
            keys[2], (NUM_PATCHES + 1, width), f32),
        "ln_pre_g": jnp.ones((width,), f32), "ln_pre_b": jnp.zeros((width,), f32),
        "ln_post_g": jnp.ones((width,), f32), "ln_post_b": jnp.zeros((width,), f32),
        "proj": scale * jax.random.normal(keys[3], (width, EMBED_DIM), f32),
        "layers": [layer(keys[4 + i]) for i in range(NUM_LAYERS)],
    }


def pack_visual_params(vp):
    """Stack per-layer weights over a leading layer axis, fuse QKV, fold the
    1/sqrt(dh) attention scale into Q, pre-add the class embedding to row 0 of
    the positional embedding, and cast matmul weights to bf16 (fp32 accum)."""
    width = VISION_WIDTH
    dh = width // NUM_HEADS
    scale = dh ** -0.5
    wdt = _MXU_DTYPE

    def stack(fn):
        return jnp.stack([fn(l) for l in vp["layers"]], axis=0)

    poscls = vp["positional_embedding"].at[0].add(vp["class_embedding"])

    return {
        "conv_w": vp["conv_w"].reshape(width, -1).T.astype(wdt),       # [C*P*P, W]
        "poscls": poscls,                                              # [S, W]
        "lnpre_g": vp["ln_pre_g"].reshape(1, width),
        "lnpre_b": vp["ln_pre_b"].reshape(1, width),
        "ln1_g": stack(lambda l: l["ln1_g"].reshape(1, width)),
        "ln1_b": stack(lambda l: l["ln1_b"].reshape(1, width)),
        "wqkv": stack(lambda l: jnp.concatenate(
            [l["wq"] * scale, l["wk"], l["wv"]], axis=1)).astype(wdt),  # [L, W, 3W]
        "bqkv": stack(lambda l: jnp.concatenate(
            [l["bq"] * scale, l["bk"], l["bv"]]).reshape(1, 3 * width)),
        "wo": stack(lambda l: l["wo"]).astype(wdt),
        "bo": stack(lambda l: l["bo"].reshape(1, width)),
        "ln2_g": stack(lambda l: l["ln2_g"].reshape(1, width)),
        "ln2_b": stack(lambda l: l["ln2_b"].reshape(1, width)),
        "w1": stack(lambda l: l["w1"]).astype(wdt),
        "b1": stack(lambda l: l["b1"].reshape(1, FFN_DIM)),
        "w2": stack(lambda l: l["w2"]).astype(wdt),
        "b2": stack(lambda l: l["b2"].reshape(1, width)),
        "lnpost_g": vp["ln_post_g"].reshape(1, width),
        "lnpost_b": vp["ln_post_b"].reshape(1, width),
        "proj": vp["proj"].astype(wdt),
    }


# ----------------------------------- main ------------------------------------

if __name__ == "__main__":
    key = jax.random.PRNGKey(0)
    k_params, k_img = jax.random.split(key, 2)

    params = init_visual_params(k_params)
    packed = pack_visual_params(params)

    image = jax.random.normal(
        k_img, (BATCH, 3, IMAGE_RESOLUTION, IMAGE_RESOLUTION), jnp.float32)

    feats = visual_transformer_forward(image, packed)
    jax.block_until_ready(feats)

    assert feats.shape == (BATCH, EMBED_DIM)
    assert bool(jnp.isfinite(feats).all())
    print("KERNEL_OK")
</pallas_src>

<mosaic_0001>
module attributes {stable_mosaic.version = 11 : i64} {
  func.func @_vit_tower_kernel(%arg0: i32, %arg1: memref<1x17x48xbf16, #tpu.memory_space<vmem>>, %arg2: memref<48x32xbf16, #tpu.memory_space<vmem>>, %arg3: memref<17x32xf32, #tpu.memory_space<vmem>>, %arg4: memref<1x32xf32, #tpu.memory_space<vmem>>, %arg5: memref<1x32xf32, #tpu.memory_space<vmem>>, %arg6: memref<2x1x32xf32, #tpu.memory_space<vmem>>, %arg7: memref<2x1x32xf32, #tpu.memory_space<vmem>>, %arg8: memref<2x32x96xbf16, #tpu.memory_space<vmem>>, %arg9: memref<2x1x96xf32, #tpu.memory_space<vmem>>, %arg10: memref<2x32x32xbf16, #tpu.memory_space<vmem>>, %arg11: memref<2x1x32xf32, #tpu.memory_space<vmem>>, %arg12: memref<2x1x32xf32, #tpu.memory_space<vmem>>, %arg13: memref<2x1x32xf32, #tpu.memory_space<vmem>>, %arg14: memref<2x32x64xbf16, #tpu.memory_space<vmem>>, %arg15: memref<2x1x64xf32, #tpu.memory_space<vmem>>, %arg16: memref<2x64x32xbf16, #tpu.memory_space<vmem>>, %arg17: memref<2x1x32xf32, #tpu.memory_space<vmem>>, %arg18: memref<1x32xf32, #tpu.memory_space<vmem>>, %arg19: memref<1x32xf32, #tpu.memory_space<vmem>>, %arg20: memref<32x32xbf16, #tpu.memory_space<vmem>>, %arg21: memref<1x1x32xf32, #tpu.memory_space<vmem>>) attributes {dimension_semantics = [#tpu.dimension_semantics<parallel>], iteration_bounds = array<i64: 2>, scalar_prefetch = 0 : i64, scratch_operands = 0 : i64, tpu.core_type = #tpu.core_type<tc>, window_params = [{transform_indices = @transform_0, window_bounds = array<i64: 1, 17, 48>}, {pipeline_mode = #tpu.pipeline_mode<synchronous>, transform_indices = @transform_1, window_bounds = array<i64: 48, 32>}, {pipeline_mode = #tpu.pipeline_mode<synchronous>, transform_indices = @transform_2, window_bounds = array<i64: 17, 32>}, {pipeline_mode = #tpu.pipeline_mode<synchronous>, transform_indices = @transform_3, window_bounds = array<i64: 1, 32>}, {pipeline_mode = #tpu.pipeline_mode<synchronous>, transform_indices = @transform_4, window_bounds = array<i64: 1, 32>}, {pipeline_mode = #tpu.pipeline_mode<synchronous>, transform_indices = @transform_5, window_bounds = array<i64: 2, 1, 32>}, {pipeline_mode = #tpu.pipeline_mode<synchronous>, transform_indices = @transform_6, window_bounds = array<i64: 2, 1, 32>}, {pipeline_mode = #tpu.pipeline_mode<synchronous>, transform_indices = @transform_7, window_bounds = array<i64: 2, 32, 96>}, {pipeline_mode = #tpu.pipeline_mode<synchronous>, transform_indices = @transform_8, window_bounds = array<i64: 2, 1, 96>}, {pipeline_mode = #tpu.pipeline_mode<synchronous>, transform_indices = @transform_9, window_bounds = array<i64: 2, 32, 32>}, {pipeline_mode = #tpu.pipeline_mode<synchronous>, transform_indices = @transform_10, window_bounds = array<i64: 2, 1, 32>}, {pipeline_mode = #tpu.pipeline_mode<synchronous>, transform_indices = @transform_11, window_bounds = array<i64: 2, 1, 32>}, {pipeline_mode = #tpu.pipeline_mode<synchronous>, transform_indices = @transform_12, window_bounds = array<i64: 2, 1, 32>}, {pipeline_mode = #tpu.pipeline_mode<synchronous>, transform_indices = @transform_13, window_bounds = array<i64: 2, 32, 64>}, {pipeline_mode = #tpu.pipeline_mode<synchronous>, transform_indices = @transform_14, window_bounds = array<i64: 2, 1, 64>}, {pipeline_mode = #tpu.pipeline_mode<synchronous>, transform_indices = @transform_15, window_bounds = array<i64: 2, 64, 32>}, {pipeline_mode = #tpu.pipeline_mode<synchronous>, transform_indices = @transform_16, window_bounds = array<i64: 2, 1, 32>}, {pipeline_mode = #tpu.pipeline_mode<synchronous>, transform_indices = @transform_17, window_bounds = array<i64: 1, 32>}, {pipeline_mode = #tpu.pipeline_mode<synchronous>, transform_indices = @transform_18, window_bounds = array<i64: 1, 32>}, {pipeline_mode = #tpu.pipeline_mode<synchronous>, transform_indices = @transform_19, window_bounds = array<i64: 32, 32>}, {transform_indices = @transform_20, window_bounds = array<i64: 1, 1, 32>}]} {
    %c0 = arith.constant 0 : index
    %c0_0 = arith.constant 0 : index
    %c0_1 = arith.constant 0 : index
    %0 = vector.load %arg1[%c0, %c0_0, %c0_1] : memref<1x17x48xbf16, #tpu.memory_space<vmem>>, vector<1x17x48xbf16>
    %1 = vector.shape_cast %0 : vector<1x17x48xbf16> to vector<17x48xbf16>
    %c0_2 = arith.constant 0 : index
    %c0_3 = arith.constant 0 : index
    %2 = vector.load %arg2[%c0_2, %c0_3] : memref<48x32xbf16, #tpu.memory_space<vmem>>, vector<48x32xbf16>
    %cst = arith.constant dense<0.000000e+00> : vector<17x32xf32>
    %3 = tpu.matmul %1, %2, %cst {dimension_numbers = #tpu.dot_dimension_numbers<[1], [0], [0], [1], [0, 0, 1, 1], [], []>} : vector<17x48xbf16>, vector<48x32xbf16>, vector<17x32xf32> -> vector<17x32xf32>
    %c0_4 = arith.constant 0 : index
    %c0_5 = arith.constant 0 : index
    %4 = vector.load %arg3[%c0_4, %c0_5] : memref<17x32xf32, #tpu.memory_space<vmem>>, vector<17x32xf32>
    %5 = arith.addf %3, %4 : vector<17x32xf32>
    %c0_6 = arith.constant 0 : index
    %c0_7 = arith.constant 0 : index
    %6 = vector.load %arg4[%c0_6, %c0_7] : memref<1x32xf32, #tpu.memory_space<vmem>>, vector<1x32xf32>
    %c0_8 = arith.constant 0 : index
    %c0_9 = arith.constant 0 : index
    %7 = vector.load %arg5[%c0_8, %c0_9] : memref<1x32xf32, #tpu.memory_space<vmem>>, vector<1x32xf32>
    %cst_10 = arith.constant dense<0.000000e+00> : vector<17xf32>
    %8 = vector.multi_reduction <add>, %5, %cst_10 [1] : vector<17x32xf32> to vector<17xf32>
    %9 = vector.shape_cast %8 : vector<17xf32> to vector<17x1xf32>
    %cst_11 = arith.constant 3.200000e+01 : f32
    %10 = vector.broadcast %cst_11 : f32 to vector<17x1xf32>
    %11 = arith.divf %9, %10 : vector<17x1xf32>
    %12 = vector.broadcast %11 : vector<17x1xf32> to vector<17x32xf32>
    %13 = arith.subf %5, %12 : vector<17x32xf32>
    %14 = arith.mulf %13, %13 : vector<17x32xf32>
    %cst_12 = arith.constant dense<0.000000e+00> : vector<17xf32>
    %15 = vector.multi_reduction <add>, %14, %cst_12 [1] : vector<17x32xf32> to vector<17xf32>
    %16 = vector.shape_cast %15 : vector<17xf32> to vector<17x1xf32>
    %cst_13 = arith.constant 3.200000e+01 : f32
    %17 = vector.broadcast %cst_13 : f32 to vector<17x1xf32>
    %18 = arith.divf %16, %17 : vector<17x1xf32>
    %cst_14 = arith.constant 9.99999974E-6 : f32
    %19 = vector.broadcast %cst_14 : f32 to vector<17x1xf32>
    %20 = arith.addf %18, %19 : vector<17x1xf32>
    %21 = math.rsqrt %20 : vector<17x1xf32>
    %22 = vector.broadcast %21 : vector<17x1xf32> to vector<17x32xf32>
    %23 = arith.mulf %13, %22 : vector<17x32xf32>
    %24 = vector.broadcast %6 : vector<1x32xf32> to vector<17x32xf32>
    %25 = arith.mulf %23, %24 : vector<17x32xf32>
    %26 = vector.broadcast %7 : vector<1x32xf32> to vector<17x32xf32>
    %27 = arith.addf %25, %26 : vector<17x32xf32>
    %c0_i32 = arith.constant 0 : i32
    %c2_i32 = arith.constant 2 : i32
    %28 = arith.addi %c0_i32, %c2_i32 : i32
    %c1_i32 = arith.constant 1 : i32
    %29 = scf.for %arg22 = %c0_i32 to %28 step %c1_i32 iter_args(%arg23 = %27) -> (vector<17x32xf32>)  : i32 {
      %57 = arith.index_cast %arg22 : i32 to index
      %c0_31 = arith.constant 0 : index
      %c0_32 = arith.constant 0 : index
      %58 = vector.load %arg6[%57, %c0_31, %c0_32] : memref<2x1x32xf32, #tpu.memory_space<vmem>>, vector<1x1x32xf32>
      %59 = vector.shape_cast %58 : vector<1x1x32xf32> to vector<1x32xf32>
      %60 = arith.index_cast %arg22 : i32 to index
      %c0_33 = arith.constant 0 : index
      %c0_34 = arith.constant 0 : index
      %61 = vector.load %arg7[%60, %c0_33, %c0_34] : memref<2x1x32xf32, #tpu.memory_space<vmem>>, vector<1x1x32xf32>
      %62 = vector.shape_cast %61 : vector<1x1x32xf32> to vector<1x32xf32>
      %cst_35 = arith.constant dense<0.000000e+00> : vector<17xf32>
      %63 = vector.multi_reduction <add>, %arg23, %cst_35 [1] : vector<17x32xf32> to vector<17xf32>
      %64 = vector.shape_cast %63 : vector<17xf32> to vector<17x1xf32>
      %cst_36 = arith.constant 3.200000e+01 : f32
      %65 = vector.broadcast %cst_36 : f32 to vector<17x1xf32>
      %66 = arith.divf %64, %65 : vector<17x1xf32>
      %67 = vector.broadcast %66 : vector<17x1xf32> to vector<17x32xf32>
      %68 = arith.subf %arg23, %67 : vector<17x32xf32>
      %69 = arith.mulf %68, %68 : vector<17x32xf32>
      %cst_37 = arith.constant dense<0.000000e+00> : vector<17xf32>
      %70 = vector.multi_reduction <add>, %69, %cst_37 [1] : vector<17x32xf32> to vector<17xf32>
      %71 = vector.shape_cast %70 : vector<17xf32> to vector<17x1xf32>
      %cst_38 = arith.constant 3.200000e+01 : f32
      %72 = vector.broadcast %cst_38 : f32 to vector<17x1xf32>
      %73 = arith.divf %71, %72 : vector<17x1xf32>
      %cst_39 = arith.constant 9.99999974E-6 : f32
      %74 = vector.broadcast %cst_39 : f32 to vector<17x1xf32>
      %75 = arith.addf %73, %74 : vector<17x1xf32>
      %76 = math.rsqrt %75 : vector<17x1xf32>
      %77 = vector.broadcast %76 : vector<17x1xf32> to vector<17x32xf32>
      %78 = arith.mulf %68, %77 : vector<17x32xf32>
      %79 = vector.broadcast %59 : vector<1x32xf32> to vector<17x32xf32>
      %80 = arith.mulf %78, %79 : vector<17x32xf32>
      %81 = vector.broadcast %62 : vector<1x32xf32> to vector<17x32xf32>
      %82 = arith.addf %80, %81 : vector<17x32xf32>
      %83 = arith.truncf %82 : vector<17x32xf32> to vector<17x32xbf16>
      %84 = arith.index_cast %arg22 : i32 to index
      %c0_40 = arith.constant 0 : index
      %c0_41 = arith.constant 0 : index
      %85 = vector.load %arg8[%84, %c0_40, %c0_41] : memref<2x32x96xbf16, #tpu.memory_space<vmem>>, vector<1x32x96xbf16>
      %86 = vector.shape_cast %85 : vector<1x32x96xbf16> to vector<32x96xbf16>
      %cst_42 = arith.constant dense<0.000000e+00> : vector<17x96xf32>
      %87 = tpu.matmul %83, %86, %cst_42 {dimension_numbers = #tpu.dot_dimension_numbers<[1], [0], [0], [1], [0, 0, 1, 1], [], []>} : vector<17x32xbf16>, vector<32x96xbf16>, vector<17x96xf32> -> vector<17x96xf32>
      %88 = arith.index_cast %arg22 : i32 to index
      %c0_43 = arith.constant 0 : index
      %c0_44 = arith.constant 0 : index
      %89 = vector.load %arg9[%88, %c0_43, %c0_44] : memref<2x1x96xf32, #tpu.memory_space<vmem>>, vector<1x1x96xf32>
      %90 = vector.shape_cast %89 : vector<1x1x96xf32> to vector<1x96xf32>
      %91 = vector.broadcast %90 : vector<1x96xf32> to vector<17x96xf32>
      %92 = arith.addf %87, %91 : vector<17x96xf32>
      %93 = arith.truncf %92 : vector<17x96xf32> to vector<17x96xbf16>
      %94 = vector.extract_strided_slice %93 {offsets = [0, 0], sizes = [17, 8], strides = [1, 1]} : vector<17x96xbf16> to vector<17x8xbf16>
      %95 = vector.extract_strided_slice %93 {offsets = [0, 32], sizes = [17, 8], strides = [1, 1]} : vector<17x96xbf16> to vector<17x8xbf16>
      %96 = vector.extract_strided_slice %93 {offsets = [0, 64], sizes = [17, 8], strides = [1, 1]} : vector<17x96xbf16> to vector<17x8xbf16>
      %cst_45 = arith.constant dense<0.000000e+00> : vector<17x17xf32>
      %97 = tpu.matmul %94, %95, %cst_45 {dimension_numbers = #tpu.dot_dimension_numbers<[1], [1], [0], [0], [0, 0, 1, 0], [], []>} : vector<17x8xbf16>, vector<17x8xbf16>, vector<17x17xf32> -> vector<17x17xf32>
      %cst_46 = arith.constant dense<0xFF800000> : vector<17xf32>
      %98 = vector.multi_reduction <maximumf>, %97, %cst_46 [1] : vector<17x17xf32> to vector<17xf32>
      %99 = vector.shape_cast %98 : vector<17xf32> to vector<17x1xf32>
      %100 = vector.broadcast %99 : vector<17x1xf32> to vector<17x17xf32>
      %101 = arith.subf %97, %100 : vector<17x17xf32>
      %102 = math.exp %101 : vector<17x17xf32>
      %cst_47 = arith.constant dense<0.000000e+00> : vector<17xf32>
      %103 = vector.multi_reduction <add>, %102, %cst_47 [1] : vector<17x17xf32> to vector<17xf32>
      %104 = vector.shape_cast %103 : vector<17xf32> to vector<17x1xf32>
      %105 = tpu.reciprocal %104 {approx = true} : vector<17x1xf32> -> vector<17x1xf32>
      %106 = vector.broadcast %105 : vector<17x1xf32> to vector<17x17xf32>
      %107 = arith.mulf %102, %106 : vector<17x17xf32>
      %108 = arith.truncf %107 : vector<17x17xf32> to vector<17x17xbf16>
      %cst_48 = arith.constant dense<0.000000e+00> : vector<17x8xf32>
      %109 = tpu.matmul %108, %96, %cst_48 {dimension_numbers = #tpu.dot_dimension_numbers<[1], [0], [0], [1], [0, 0, 1, 1], [], []>} : vector<17x17xbf16>, vector<17x8xbf16>, vector<17x8xf32> -> vector<17x8xf32>
      %110 = vector.extract_strided_slice %93 {offsets = [0, 8], sizes = [17, 8], strides = [1, 1]} : vector<17x96xbf16> to vector<17x8xbf16>
      %111 = vector.extract_strided_slice %93 {offsets = [0, 40], sizes = [17, 8], strides = [1, 1]} : vector<17x96xbf16> to vector<17x8xbf16>
      %112 = vector.extract_strided_slice %93 {offsets = [0, 72], sizes = [17, 8], strides = [1, 1]} : vector<17x96xbf16> to vector<17x8xbf16>
      %cst_49 = arith.constant dense<0.000000e+00> : vector<17x17xf32>
      %113 = tpu.matmul %110, %111, %cst_49 {dimension_numbers = #tpu.dot_dimension_numbers<[1], [1], [0], [0], [0, 0, 1, 0], [], []>} : vector<17x8xbf16>, vector<17x8xbf16>, vector<17x17xf32> -> vector<17x17xf32>
      %cst_50 = arith.constant dense<0xFF800000> : vector<17xf32>
      %114 = vector.multi_reduction <maximumf>, %113, %cst_50 [1] : vector<17x17xf32> to vector<17xf32>
      %115 = vector.shape_cast %114 : vector<17xf32> to vector<17x1xf32>
      %116 = vector.broadcast %115 : vector<17x1xf32> to vector<17x17xf32>
      %117 = arith.subf %113, %116 : vector<17x17xf32>
      %118 = math.exp %117 : vector<17x17xf32>
      %cst_51 = arith.constant dense<0.000000e+00> : vector<17xf32>
      %119 = vector.multi_reduction <add>, %118, %cst_51 [1] : vector<17x17xf32> to vector<17xf32>
      %120 = vector.shape_cast %119 : vector<17xf32> to vector<17x1xf32>
      %121 = tpu.reciprocal %120 {approx = true} : vector<17x1xf32> -> vector<17x1xf32>
      %122 = vector.broadcast %121 : vector<17x1xf32> to vector<17x17xf32>
      %123 = arith.mulf %118, %122 : vector<17x17xf32>
      %124 = arith.truncf %123 : vector<17x17xf32> to vector<17x17xbf16>
      %cst_52 = arith.constant dense<0.000000e+00> : vector<17x8xf32>
      %125 = tpu.matmul %124, %112, %cst_52 {dimension_numbers = #tpu.dot_dimension_numbers<[1], [0], [0], [1], [0, 0, 1, 1], [], []>} : vector<17x17xbf16>, vector<17x8xbf16>, vector<17x8xf32> -> vector<17x8xf32>
      %126 = vector.extract_strided_slice %93 {offsets = [0, 16], sizes = [17, 8], strides = [1, 1]} : vector<17x96xbf16> to vector<17x8xbf16>
      %127 = vector.extract_strided_slice %93 {offsets = [0, 48], sizes = [17, 8], strides = [1, 1]} : vector<17x96xbf16> to vector<17x8xbf16>
      %128 = vector.extract_strided_slice %93 {offsets = [0, 80], sizes = [17, 8], strides = [1, 1]} : vector<17x96xbf16> to vector<17x8xbf16>
      %cst_53 = arith.constant dense<0.000000e+00> : vector<17x17xf32>
      %129 = tpu.matmul %126, %127, %cst_53 {dimension_numbers = #tpu.dot_dimension_numbers<[1], [1], [0], [0], [0, 0, 1, 0], [], []>} : vector<17x8xbf16>, vector<17x8xbf16>, vector<17x17xf32> -> vector<17x17xf32>
      %cst_54 = arith.constant dense<0xFF800000> : vector<17xf32>
      %130 = vector.multi_reduction <maximumf>, %129, %cst_54 [1] : vector<17x17xf32> to vector<17xf32>
      %131 = vector.shape_cast %130 : vector<17xf32> to vector<17x1xf32>
      %132 = vector.broadcast %131 : vector<17x1xf32> to vector<17x17xf32>
      %133 = arith.subf %129, %132 : vector<17x17xf32>
      %134 = math.exp %133 : vector<17x17xf32>
      %cst_55 = arith.constant dense<0.000000e+00> : vector<17xf32>
      %135 = vector.multi_reduction <add>, %134, %cst_55 [1] : vector<17x17xf32> to vector<17xf32>
      %136 = vector.shape_cast %135 : vector<17xf32> to vector<17x1xf32>
      %137 = tpu.reciprocal %136 {approx = true} : vector<17x1xf32> -> vector<17x1xf32>
      %138 = vector.broadcast %137 : vector<17x1xf32> to vector<17x17xf32>
      %139 = arith.mulf %134, %138 : vector<17x17xf32>
      %140 = arith.truncf %139 : vector<17x17xf32> to vector<17x17xbf16>
      %cst_56 = arith.constant dense<0.000000e+00> : vector<17x8xf32>
      %141 = tpu.matmul %140, %128, %cst_56 {dimension_numbers = #tpu.dot_dimension_numbers<[1], [0], [0], [1], [0, 0, 1, 1], [], []>} : vector<17x17xbf16>, vector<17x8xbf16>, vector<17x8xf32> -> vector<17x8xf32>
      %142 = vector.extract_strided_slice %93 {offsets = [0, 24], sizes = [17, 8], strides = [1, 1]} : vector<17x96xbf16> to vector<17x8xbf16>
      %143 = vector.extract_strided_slice %93 {offsets = [0, 56], sizes = [17, 8], strides = [1, 1]} : vector<17x96xbf16> to vector<17x8xbf16>
      %144 = vector.extract_strided_slice %93 {offsets = [0, 88], sizes = [17, 8], strides = [1, 1]} : vector<17x96xbf16> to vector<17x8xbf16>
      %cst_57 = arith.constant dense<0.000000e+00> : vector<17x17xf32>
      %145 = tpu.matmul %142, %143, %cst_57 {dimension_numbers = #tpu.dot_dimension_numbers<[1], [1], [0], [0], [0, 0, 1, 0], [], []>} : vector<17x8xbf16>, vector<17x8xbf16>, vector<17x17xf32> -> vector<17x17xf32>
      %cst_58 = arith.constant dense<0xFF800000> : vector<17xf32>
      %146 = vector.multi_reduction <maximumf>, %145, %cst_58 [1] : vector<17x17xf32> to vector<17xf32>
      %147 = vector.shape_cast %146 : vector<17xf32> to vector<17x1xf32>
      %148 = vector.broadcast %147 : vector<17x1xf32> to vector<17x17xf32>
      %149 = arith.subf %145, %148 : vector<17x17xf32>
      %150 = math.exp %149 : vector<17x17xf32>
      %cst_59 = arith.constant dense<0.000000e+00> : vector<17xf32>
      %151 = vector.multi_reduction <add>, %150, %cst_59 [1] : vector<17x17xf32> to vector<17xf32>
      %152 = vector.shape_cast %151 : vector<17xf32> to vector<17x1xf32>
      %153 = tpu.reciprocal %152 {approx = true} : vector<17x1xf32> -> vector<17x1xf32>
      %154 = vector.broadcast %153 : vector<17x1xf32> to vector<17x17xf32>
      %155 = arith.mulf %150, %154 : vector<17x17xf32>
      %156 = arith.truncf %155 : vector<17x17xf32> to vector<17x17xbf16>
      %cst_60 = arith.constant dense<0.000000e+00> : vector<17x8xf32>
      %157 = tpu.matmul %156, %144, %cst_60 {dimension_numbers = #tpu.dot_dimension_numbers<[1], [0], [0], [1], [0, 0, 1, 1], [], []>} : vector<17x17xbf16>, vector<17x8xbf16>, vector<17x8xf32> -> vector<17x8xf32>
      %158 = tpu.concatenate %109, %125, %141, %157 in 1 : vector<17x8xf32>, vector<17x8xf32>, vector<17x8xf32>, vector<17x8xf32> -> vector<17x32xf32>
      %159 = arith.truncf %158 : vector<17x32xf32> to vector<17x32xbf16>
      %160 = arith.index_cast %arg22 : i32 to index
      %c0_61 = arith.constant 0 : index
      %c0_62 = arith.constant 0 : index
      %161 = vector.load %arg10[%160, %c0_61, %c0_62] : memref<2x32x32xbf16, #tpu.memory_space<vmem>>, vector<1x32x32xbf16>
      %162 = vector.shape_cast %161 : vector<1x32x32xbf16> to vector<32x32xbf16>
      %cst_63 = arith.constant dense<0.000000e+00> : vector<17x32xf32>
      %163 = tpu.matmul %159, %162, %cst_63 {dimension_numbers = #tpu.dot_dimension_numbers<[1], [0], [0], [1], [0, 0, 1, 1], [], []>} : vector<17x32xbf16>, vector<32x32xbf16>, vector<17x32xf32> -> vector<17x32xf32>
      %164 = arith.addf %arg23, %163 : vector<17x32xf32>
      %165 = arith.index_cast %arg22 : i32 to index
      %c0_64 = arith.constant 0 : index
      %c0_65 = arith.constant 0 : index
      %166 = vector.load %arg11[%165, %c0_64, %c0_65] : memref<2x1x32xf32, #tpu.memory_space<vmem>>, vector<1x1x32xf32>
      %167 = vector.shape_cast %166 : vector<1x1x32xf32> to vector<1x32xf32>
      %168 = vector.broadcast %167 : vector<1x32xf32> to vector<17x32xf32>
      %169 = arith.addf %164, %168 : vector<17x32xf32>
      %170 = arith.index_cast %arg22 : i32 to index
      %c0_66 = arith.constant 0 : index
      %c0_67 = arith.constant 0 : index
      %171 = vector.load %arg12[%170, %c0_66, %c0_67] : memref<2x1x32xf32, #tpu.memory_space<vmem>>, vector<1x1x32xf32>
      %172 = vector.shape_cast %171 : vector<1x1x32xf32> to vector<1x32xf32>
      %173 = arith.index_cast %arg22 : i32 to index
      %c0_68 = arith.constant 0 : index
      %c0_69 = arith.constant 0 : index
      %174 = vector.load %arg13[%173, %c0_68, %c0_69] : memref<2x1x32xf32, #tpu.memory_space<vmem>>, vector<1x1x32xf32>
      %175 = vector.shape_cast %174 : vector<1x1x32xf32> to vector<1x32xf32>
      %cst_70 = arith.constant dense<0.000000e+00> : vector<17xf32>
      %176 = vector.multi_reduction <add>, %169, %cst_70 [1] : vector<17x32xf32> to vector<17xf32>
      %177 = vector.shape_cast %176 : vector<17xf32> to vector<17x1xf32>
      %cst_71 = arith.constant 3.200000e+01 : f32
      %178 = vector.broadcast %cst_71 : f32 to vector<17x1xf32>
      %179 = arith.divf %177, %178 : vector<17x1xf32>
      %180 = vector.broadcast %179 : vector<17x1xf32> to vector<17x32xf32>
      %181 = arith.subf %169, %180 : vector<17x32xf32>
      %182 = arith.mulf %181, %181 : vector<17x32xf32>
      %cst_72 = arith.constant dense<0.000000e+00> : vector<17xf32>
      %183 = vector.multi_reduction <add>, %182, %cst_72 [1] : vector<17x32xf32> to vector<17xf32>
      %184 = vector.shape_cast %183 : vector<17xf32> to vector<17x1xf32>
      %cst_73 = arith.constant 3.200000e+01 : f32
      %185 = vector.broadcast %cst_73 : f32 to vector<17x1xf32>
      %186 = arith.divf %184, %185 : vector<17x1xf32>
      %cst_74 = arith.constant 9.99999974E-6 : f32
      %187 = vector.broadcast %cst_74 : f32 to vector<17x1xf32>
      %188 = arith.addf %186, %187 : vector<17x1xf32>
      %189 = math.rsqrt %188 : vector<17x1xf32>
      %190 = vector.broadcast %189 : vector<17x1xf32> to vector<17x32xf32>
      %191 = arith.mulf %181, %190 : vector<17x32xf32>
      %192 = vector.broadcast %172 : vector<1x32xf32> to vector<17x32xf32>
      %193 = arith.mulf %191, %192 : vector<17x32xf32>
      %194 = vector.broadcast %175 : vector<1x32xf32> to vector<17x32xf32>
      %195 = arith.addf %193, %194 : vector<17x32xf32>
      %196 = arith.truncf %195 : vector<17x32xf32> to vector<17x32xbf16>
      %197 = arith.index_cast %arg22 : i32 to index
      %c0_75 = arith.constant 0 : index
      %c0_76 = arith.constant 0 : index
      %198 = vector.load %arg14[%197, %c0_75, %c0_76] : memref<2x32x64xbf16, #tpu.memory_space<vmem>>, vector<1x32x64xbf16>
      %199 = vector.shape_cast %198 : vector<1x32x64xbf16> to vector<32x64xbf16>
      %cst_77 = arith.constant dense<0.000000e+00> : vector<17x64xf32>
      %200 = tpu.matmul %196, %199, %cst_77 {dimension_numbers = #tpu.dot_dimension_numbers<[1], [0], [0], [1], [0, 0, 1, 1], [], []>} : vector<17x32xbf16>, vector<32x64xbf16>, vector<17x64xf32> -> vector<17x64xf32>
      %201 = arith.index_cast %arg22 : i32 to index
      %c0_78 = arith.constant 0 : index
      %c0_79 = arith.constant 0 : index
      %202 = vector.load %arg15[%201, %c0_78, %c0_79] : memref<2x1x64xf32, #tpu.memory_space<vmem>>, vector<1x1x64xf32>
      %203 = vector.shape_cast %202 : vector<1x1x64xf32> to vector<1x64xf32>
      %204 = vector.broadcast %203 : vector<1x64xf32> to vector<17x64xf32>
      %205 = arith.addf %200, %204 : vector<17x64xf32>
      %cst_80 = arith.constant 1.702000e+00 : f32
      %206 = vector.broadcast %cst_80 : f32 to vector<17x64xf32>
      %207 = arith.mulf %206, %205 : vector<17x64xf32>
      %208 = arith.negf %207 : vector<17x64xf32>
      %209 = math.exp %208 : vector<17x64xf32>
      %cst_81 = arith.constant 1.000000e+00 : f32
      %210 = vector.broadcast %cst_81 : f32 to vector<17x64xf32>
      %211 = arith.addf %210, %209 : vector<17x64xf32>
      %212 = arith.divf %210, %211 : vector<17x64xf32>
      %213 = arith.mulf %205, %212 : vector<17x64xf32>
      %214 = arith.truncf %213 : vector<17x64xf32> to vector<17x64xbf16>
      %215 = arith.index_cast %arg22 : i32 to index
      %c0_82 = arith.constant 0 : index
      %c0_83 = arith.constant 0 : index
      %216 = vector.load %arg16[%215, %c0_82, %c0_83] : memref<2x64x32xbf16, #tpu.memory_space<vmem>>, vector<1x64x32xbf16>
      %217 = vector.shape_cast %216 : vector<1x64x32xbf16> to vector<64x32xbf16>
      %cst_84 = arith.constant dense<0.000000e+00> : vector<17x32xf32>
      %218 = tpu.matmul %214, %217, %cst_84 {dimension_numbers = #tpu.dot_dimension_numbers<[1], [0], [0], [1], [0, 0, 1, 1], [], []>} : vector<17x64xbf16>, vector<64x32xbf16>, vector<17x32xf32> -> vector<17x32xf32>
      %219 = arith.addf %169, %218 : vector<17x32xf32>
      %220 = arith.index_cast %arg22 : i32 to index
      %c0_85 = arith.constant 0 : index
      %c0_86 = arith.constant 0 : index
      %221 = vector.load %arg17[%220, %c0_85, %c0_86] : memref<2x1x32xf32, #tpu.memory_space<vmem>>, vector<1x1x32xf32>
      %222 = vector.shape_cast %221 : vector<1x1x32xf32> to vector<1x32xf32>
      %223 = vector.broadcast %222 : vector<1x32xf32> to vector<17x32xf32>
      %224 = arith.addf %219, %223 : vector<17x32xf32>
      scf.yield %224 : vector<17x32xf32>
    }
    %c2_i32_15 = arith.constant 2 : i32
    %30 = vector.extract_strided_slice %29 {offsets = [0, 0], sizes = [1, 32], strides = [1, 1]} : vector<17x32xf32> to vector<1x32xf32>
    %c0_16 = arith.constant 0 : index
    %c0_17 = arith.constant 0 : index
    %31 = vector.load %arg18[%c0_16, %c0_17] : memref<1x32xf32, #tpu.memory_space<vmem>>, vector<1x32xf32>
    %c0_18 = arith.constant 0 : index
    %c0_19 = arith.constant 0 : index
    %32 = vector.load %arg19[%c0_18, %c0_19] : memref<1x32xf32, #tpu.memory_space<vmem>>, vector<1x32xf32>
    %cst_20 = arith.constant dense<0.000000e+00> : vector<1xf32>
    %33 = vector.multi_reduction <add>, %30, %cst_20 [1] : vector<1x32xf32> to vector<1xf32>
    %34 = vector.shape_cast %33 : vector<1xf32> to vector<1x1xf32>
    %cst_21 = arith.constant 3.200000e+01 : f32
    %35 = vector.broadcast %cst_21 : f32 to vector<1x1xf32>
    %36 = arith.divf %34, %35 : vector<1x1xf32>
    %37 = vector.broadcast %36 : vector<1x1xf32> to vector<1x32xf32>
    %38 = arith.subf %30, %37 : vector<1x32xf32>
    %39 = arith.mulf %38, %38 : vector<1x32xf32>
    %cst_22 = arith.constant dense<0.000000e+00> : vector<1xf32>
    %40 = vector.multi_reduction <add>, %39, %cst_22 [1] : vector<1x32xf32> to vector<1xf32>
    %41 = vector.shape_cast %40 : vector<1xf32> to vector<1x1xf32>
    %cst_23 = arith.constant 3.200000e+01 : f32
    %42 = vector.broadcast %cst_23 : f32 to vector<1x1xf32>
    %43 = arith.divf %41, %42 : vector<1x1xf32>
    %cst_24 = arith.constant 9.99999974E-6 : f32
    %44 = vector.broadcast %cst_24 : f32 to vector<1x1xf32>
    %45 = arith.addf %43, %44 : vector<1x1xf32>
    %46 = math.rsqrt %45 : vector<1x1xf32>
    %47 = vector.broadcast %46 : vector<1x1xf32> to vector<1x32xf32>
    %48 = arith.mulf %38, %47 : vector<1x32xf32>
    %49 = arith.mulf %48, %31 : vector<1x32xf32>
    %50 = arith.addf %49, %32 : vector<1x32xf32>
    %51 = arith.truncf %50 : vector<1x32xf32> to vector<1x32xbf16>
    %c0_25 = arith.constant 0 : index
    %c0_26 = arith.constant 0 : index
    %52 = vector.load %arg20[%c0_25, %c0_26] : memref<32x32xbf16, #tpu.memory_space<vmem>>, vector<32x32xbf16>
    %cst_27 = arith.constant dense<0.000000e+00> : vector<1x32xf32>
    %53 = tpu.matmul %51, %52, %cst_27 {dimension_numbers = #tpu.dot_dimension_numbers<[1], [0], [0], [1], [0, 0, 1, 1], [], []>} : vector<1x32xbf16>, vector<32x32xbf16>, vector<1x32xf32> -> vector<1x32xf32>
    %c0_28 = arith.constant 0 : index
    %c0_29 = arith.constant 0 : index
    %c0_30 = arith.constant 0 : index
    %54 = vector.load %arg21[%c0_28, %c0_29, %c0_30] : memref<1x1x32xf32, #tpu.memory_space<vmem>>, vector<1x1x32xf32>
    %55 = vector.shape_cast %54 : vector<1x1x32xf32> to vector<1x32xf32>
    %56 = vector.shape_cast %53 : vector<1x32xf32> to vector<1x1x32xf32>
    tpu.vector_store %arg21[%c0_28, %c0_29, %c0_30], %56 {strides = array<i32>} : memref<1x1x32xf32, #tpu.memory_space<vmem>>, vector<1x1x32xf32>,
    return
  }
  func.func @transform_0(%arg0: i32) -> (i32, i32, i32) {
    %c0_i32 = arith.constant 0 : i32
    %c0_i32_0 = arith.constant 0 : i32
    %c0_i32_1 = arith.constant 0 : i32
    return %arg0, %c0_i32, %c0_i32_0 : i32, i32, i32
  }
  func.func @transform_1(%arg0: i32) -> (i32, i32) {
    %c0_i32 = arith.constant 0 : i32
    %c0_i32_0 = arith.constant 0 : i32
    %c0_i32_1 = arith.constant 0 : i32
    return %c0_i32, %c0_i32_0 : i32, i32
  }
  func.func @transform_2(%arg0: i32) -> (i32, i32) {
    %c0_i32 = arith.constant 0 : i32
    %c0_i32_0 = arith.constant 0 : i32
    %c0_i32_1 = arith.constant 0 : i32
    return %c0_i32, %c0_i32_0 : i32, i32
  }
  func.func @transform_3(%arg0: i32) -> (i32, i32) {
    %c0_i32 = arith.constant 0 : i32
    %c0_i32_0 = arith.constant 0 : i32
    %c0_i32_1 = arith.constant 0 : i32
    return %c0_i32, %c0_i32_0 : i32, i32
  }
  func.func @transform_4(%arg0: i32) -> (i32, i32) {
    %c0_i32 = arith.constant 0 : i32
    %c0_i32_0 = arith.constant 0 : i32
    %c0_i32_1 = arith.constant 0 : i32
    return %c0_i32, %c0_i32_0 : i32, i32
  }
  func.func @transform_5(%arg0: i32) -> (i32, i32, i32) {
    %c0_i32 = arith.constant 0 : i32
    %c0_i32_0 = arith.constant 0 : i32
    %c0_i32_1 = arith.constant 0 : i32
    %c0_i32_2 = arith.constant 0 : i32
    return %c0_i32, %c0_i32_0, %c0_i32_1 : i32, i32, i32
  }
  func.func @transform_6(%arg0: i32) -> (i32, i32, i32) {
    %c0_i32 = arith.constant 0 : i32
    %c0_i32_0 = arith.constant 0 : i32
    %c0_i32_1 = arith.constant 0 : i32
    %c0_i32_2 = arith.constant 0 : i32
    return %c0_i32, %c0_i32_0, %c0_i32_1 : i32, i32, i32
  }
  func.func @transform_7(%arg0: i32) -> (i32, i32, i32) {
    %c0_i32 = arith.constant 0 : i32
    %c0_i32_0 = arith.constant 0 : i32
    %c0_i32_1 = arith.constant 0 : i32
    %c0_i32_2 = arith.constant 0 : i32
    return %c0_i32, %c0_i32_0, %c0_i32_1 : i32, i32, i32
  }
  func.func @transform_8(%arg0: i32) -> (i32, i32, i32) {
    %c0_i32 = arith.constant 0 : i32
    %c0_i32_0 = arith.constant 0 : i32
    %c0_i32_1 = arith.constant 0 : i32
    %c0_i32_2 = arith.constant 0 : i32
    return %c0_i32, %c0_i32_0, %c0_i32_1 : i32, i32, i32
  }
  func.func @transform_9(%arg0: i32) -> (i32, i32, i32) {
    %c0_i32 = arith.constant 0 : i32
    %c0_i32_0 = arith.constant 0 : i32
    %c0_i32_1 = arith.constant 0 : i32
    %c0_i32_2 = arith.constant 0 : i32
    return %c0_i32, %c0_i32_0, %c0_i32_1 : i32, i32, i32
  }
  func.func @transform_10(%arg0: i32) -> (i32, i32, i32) {
    %c0_i32 = arith.constant 0 : i32
    %c0_i32_0 = arith.constant 0 : i32
    %c0_i32_1 = arith.constant 0 : i32
    %c0_i32_2 = arith.constant 0 : i32
    return %c0_i32, %c0_i32_0, %c0_i32_1 : i32, i32, i32
  }
  func.func @transform_11(%arg0: i32) -> (i32, i32, i32) {
    %c0_i32 = arith.constant 0 : i32
    %c0_i32_0 = arith.constant 0 : i32
    %c0_i32_1 = arith.constant 0 : i32
    %c0_i32_2 = arith.constant 0 : i32
    return %c0_i32, %c0_i32_0, %c0_i32_1 : i32, i32, i32
  }
  func.func @transform_12(%arg0: i32) -> (i32, i32, i32) {
    %c0_i32 = arith.constant 0 : i32
    %c0_i32_0 = arith.constant 0 : i32
    %c0_i32_1 = arith.constant 0 : i32
    %c0_i32_2 = arith.constant 0 : i32
    return %c0_i32, %c0_i32_0, %c0_i32_1 : i32, i32, i32
  }
  func.func @transform_13(%arg0: i32) -> (i32, i32, i32) {
    %c0_i32 = arith.constant 0 : i32
    %c0_i32_0 = arith.constant 0 : i32
    %c0_i32_1 = arith.constant 0 : i32
    %c0_i32_2 = arith.constant 0 : i32
    return %c0_i32, %c0_i32_0, %c0_i32_1 : i32, i32, i32
  }
  func.func @transform_14(%arg0: i32) -> (i32, i32, i32) {
    %c0_i32 = arith.constant 0 : i32
    %c0_i32_0 = arith.constant 0 : i32
    %c0_i32_1 = arith.constant 0 : i32
    %c0_i32_2 = arith.constant 0 : i32
    return %c0_i32, %c0_i32_0, %c0_i32_1 : i32, i32, i32
  }
  func.func @transform_15(%arg0: i32) -> (i32, i32, i32) {
    %c0_i32 = arith.constant 0 : i32
    %c0_i32_0 = arith.constant 0 : i32
    %c0_i32_1 = arith.constant 0 : i32
    %c0_i32_2 = arith.constant 0 : i32
    return %c0_i32, %c0_i32_0, %c0_i32_1 : i32, i32, i32
  }
  func.func @transform_16(%arg0: i32) -> (i32, i32, i32) {
    %c0_i32 = arith.constant 0 : i32
    %c0_i32_0 = arith.constant 0 : i32
    %c0_i32_1 = arith.constant 0 : i32
    %c0_i32_2 = arith.constant 0 : i32
    return %c0_i32, %c0_i32_0, %c0_i32_1 : i32, i32, i32
  }
  func.func @transform_17(%arg0: i32) -> (i32, i32) {
    %c0_i32 = arith.constant 0 : i32
    %c0_i32_0 = arith.constant 0 : i32
    %c0_i32_1 = arith.constant 0 : i32
    return %c0_i32, %c0_i32_0 : i32, i32
  }
  func.func @transform_18(%arg0: i32) -> (i32, i32) {
    %c0_i32 = arith.constant 0 : i32
    %c0_i32_0 = arith.constant 0 : i32
    %c0_i32_1 = arith.constant 0 : i32
    return %c0_i32, %c0_i32_0 : i32, i32
  }
  func.func @transform_19(%arg0: i32) -> (i32, i32) {
    %c0_i32 = arith.constant 0 : i32
    %c0_i32_0 = arith.constant 0 : i32
    %c0_i32_1 = arith.constant 0 : i32
    return %c0_i32, %c0_i32_0 : i32, i32
  }
  func.func @transform_20(%arg0: i32) -> (i32, i32, i32) {
    %c0_i32 = arith.constant 0 : i32
    %c0_i32_0 = arith.constant 0 : i32
    %c0_i32_1 = arith.constant 0 : i32
    return %arg0, %c0_i32, %c0_i32_0 : i32, i32, i32
  }
}

</mosaic_0001>

<bundles_post_ra>
// kernel: visual_transformer_forward.1
= control target key start
LH: loop header
LB: loop body
LE: loop exit
PB: predicated region body
PF: predicated region fallthrough
CT: control target
= control target key end

     0   :  { %s3252_s0 = inlined_call_operand.vmem [shape: bf16[2,17,48], index: 0, kind: input, shape index: {}]   ;;  %s3253_s1 = inlined_call_operand.vmem [shape: bf16[48,32], index: 1, kind: input, shape index: {}]   ;;  %s3254_s2 = inlined_call_operand.vmem [shape: f32[17,32], index: 2, kind: input, shape index: {}]   ;;  %s3255_s3 = inlined_call_operand.vmem [shape: f32[1,32], index: 3, kind: input, shape index: {}]   ;;  %s3256_s4 = inlined_call_operand.vmem [shape: f32[1,32], index: 4, kind: input, shape index: {}]   ;;  %s3257_s5 = inlined_call_operand.vmem [shape: f32[2,1,32], index: 5, kind: input, shape index: {}]   ;;  %s3258_s6 = inlined_call_operand.vmem [shape: f32[2,1,32], index: 6, kind: input, shape index: {}]   ;;  %s3259_s7 = inlined_call_operand.vmem [shape: bf16[2,32,96], index: 7, kind: input, shape index: {}]   ;;  %s3260_s8 = inlined_call_operand.vmem [shape: f32[2,1,96], index: 8, kind: input, shape index: {}]   ;;  %s3261_s9 = inlined_call_operand.vmem [shape: bf16[2,32,32], index: 9, kind: input, shape index: {}]   ;;  %s3262_s10 = inlined_call_operand.vmem [shape: f32[2,1,32], index: 10, kind: input, shape index: {}]   ;;  %s3263_s11 = inlined_call_operand.vmem [shape: f32[2,1,32], index: 11, kind: input, shape index: {}]   ;;  %s3264_s12 = inlined_call_operand.vmem [shape: f32[2,1,32], index: 12, kind: input, shape index: {}]   ;;  %s3265_s13 = inlined_call_operand.vmem [shape: bf16[2,32,64], index: 13, kind: input, shape index: {}]   ;;  %s3266_s14 = inlined_call_operand.vmem [shape: f32[2,1,64], index: 14, kind: input, shape index: {}]   ;;  %s3267_s15 = inlined_call_operand.vmem [shape: bf16[2,64,32], index: 15, kind: input, shape index: {}]   ;;  %s3268_s16 = inlined_call_operand.vmem [shape: f32[2,1,32], index: 16, kind: input, shape index: {}]   ;;  %s3269_s17 = inlined_call_operand.vmem [shape: f32[1,32], index: 17, kind: input, shape index: {}]   ;;  %s3270_s18 = inlined_call_operand.vmem [shape: f32[1,32], index: 18, kind: input, shape index: {}]   ;;  %s3271_s19 = inlined_call_operand.vmem [shape: bf16[32,32], index: 19, kind: input, shape index: {}]   ;;  %s3272_s20 = inlined_call_operand.hbm [shape: f32[2,1,32], index: 20, kind: output, shape index: {}]  }
   0x1   :  { %3282 = sst [smem:[#allocation11_spill]] %s3252_s0 }
   0x2   :  { %3283 = sst [smem:[#allocation12_spill]] %s3253_s1 }
   0x3   :  { %3284 = sst [smem:[#allocation13_spill]] %s3254_s2 }
   0x4   :  { %3285 = sst [smem:[#allocation14_spill]] %s3255_s3 }
   0x5   :  { %3286 = sst [smem:[#allocation15_spill]] %s3256_s4 }
   0x6   :  { %3287 = sst [smem:[#allocation16_spill]] %s3257_s5 }
   0x7   :  { %3288 = sst [smem:[#allocation17_spill]] %s3272_s20 }
   0x8   :  { %25 = vsyncpa [#allocation3], 0 }
   0x9   :  { %27 = vsyncpa [#allocation3 + $0x1], 0  ;;  %s2863_s1 = smov 0   ;;  %s2865_s22 = smov 0  }
   0xa   :  { %s2867_s23 = smov 0   ;;  %s2869_s24 = smov 0  }
   0xb LB: > { %3289 = sst [smem:[#allocation5_spill]] %s2710_s1  ;;  %s2884_s2 = sadd.s32 4294967295, %s2722_s24   ;;  %s2722_s24 = sphi %s2869_s24, %s3311_s24   ;;  %s2718_s23 = sphi %s2867_s23, %s3313_s23   ;;  %s2714_s22 = sphi %s2865_s22, %s3315_s22   ;;  %s2710_s1 = sphi %s2863_s1, %s3314_s1  }
   0xc   : > { %3290 = sst [smem:[#allocation6_spill]] %s2718_s23  ;;  %s2186_s25 = sadd.s32 4294967294, %s2722_s24  }
   0xd   : > { %3291 = sst [smem:[#allocation7_spill]] %s2722_s24  ;;  %s2888_s3 = sadd.s32 1, %s2722_s24  }
   0xe   : > { %3292 = sst [smem:[#allocation8_spill]] %s2888_s3  ;;  %s465_s26 = sadd.s32 1, %s2718_s23 }
   0xf   : > { %s462_s27 = ssub.s32 %s2722_s24, %s2888_s3  ;;  %p475_p0 = scmp.ne.s32.totalorder %s2718_s23, %s2714_s22 }
  0x10   : > { %p463_p1 = scmp.eq.s32.totalorder %s462_s27, 0  ;;  %p476_p2 = scmp.eq.s32.totalorder %s2884_s2, 1 }
  0x11   : > { %p481_p3 = scmp.ne.s32.totalorder %s2714_s22, %s2710_s1  ;;  %p482_p4 = scmp.eq.s32.totalorder %s2186_s25, 1 }
  0x12   : > { %s2899_s28 = scalar_select %p463_p1, %s2718_s23, %s465_s26  }
  0x13   : > { %p2901_p5 = por %p476_p2, %p475_p0  ;;  %p2905_p6 = por %p482_p4, %p481_p3 }
  0x14   : > { %3293 = sst [smem:[#allocation9_spill]] %s2899_s28  ;;  %p2189_p7 = scmp.ge.s32.totalorder %s2722_s24, 1 }
  0x15   : > { %s3295_s29 = scalar_select %p2905_p6, 1, 0 }
  0x16   : > { %p565_p8 = scmp.lt.s32.totalorder %s2722_s24, 3 }
  0x17   : > { %3296 = sst [smem:[#allocation10_spill]] %s3295_s29 }
  0x18   : > { %p566_p9 = pnand %p2189_p7, %p565_p8 }
  0x19   : > { %s3297_s25 = sld [smem:[#allocation12_spill]] (!%p566_p9)  ;;  %p622_p10 = scmp.lt.s32.totalorder (!%p566_p9), %s2884_s2, 1 }
  0x1a   : > { %569 = sbr.rel (%p566_p9) target bundleno = 5105 (0x13f1), region = 100  ;;  %s3298_s0 = sld [smem:[#allocation11_spill]] (!%p566_p9) }
  0x1b   : > { %s3299_s24 = sld [smem:[#allocation13_spill]] (!%p566_p9)  ;;  %s3303_s27 = sand.u32 (!%p566_p9), 1, %s2714_s22  }
  0x1c   : > { %s3301_s30 = sld [smem:[#allocation14_spill]] (!%p566_p9)  ;;  %s2949_s23 = scalar_lea.vmem (!%p566_p9), [#allocation2], %s3303_s27 }
  0x1d   : > { %s3302_s26 = sld [smem:[#allocation15_spill]] (!%p566_p9)  ;;  %s2957_s28 = smov (!%p566_p9), 0  }
  0x1f   : > { %v2534_v0 = vld [vmem:[%s3297_s25 + $0x10] sm:$0xff]   ;;  %v2535_v1 = vld [vmem:[%s3297_s25 + $0x8] sm:$0xff]   ;;  %v2536_v2 = vld [vmem:[%s3297_s25] sm:$0xff]   ;;  %s623_s3 = scalar_select %p622_p10, %s2884_s2, 1  ;;  %vm666_vm0 = vcmask 392192   ;;  %vm730_vm1 = vcmask 253952  }
  0x20   : > { %2319 = vmatprep.subr.bf16.mxu0 %v2534_v0  ;;  %vm723_vm2 = vcmask 261120  }
  0x21   : > { %2320 = vmatpush3.bf16.msra.mxu0 %v2534_v0  ;;  %s2445_s29 = smul.u32 12, %s623_s3  ;;  %s3300_s20 = smov %s3299_s24  ;;  %v639_v5 = vld [vmem:[%s3299_s24 + $0x10] sm:$0x1] }
  0x22   : > { %2321 = vmatprep.subr.bf16.mxu0 %v2535_v1  ;;  %v637_v7 = vld [vmem:[%s3300_s20] sm:$0xff]  ;;  %v638_v13 = vld [vmem:[%s3300_s20 + $0x8] sm:$0xff] }
  0x23   : > { %s626_s21 = scalar_lea.vmem %s3298_s0, %s2445_s29  ;;  %v2198_v43 = vld [vmem:[%s3301_s30] ss:$0 sm:$0xff] }
  0x24   : > { %v2537_v3 = vld [vmem:[%s626_s21] sm:$0xff]   ;;  %v2538_v4 = vld [vmem:[%s626_s21 + $0x8] ss:$0 sps:$4 sm:$0x11]  }
  0x25   : > { %2322 = vmatpush3.bf16.msra.mxu0 %v2535_v1  ;;  %2325 = vmatprep.mubr.msk.bf16.mxu0 %vm666_vm0, %v2537_v3  ;;  %v2199_v45 = vld [vmem:[%s3302_s26] ss:$0 sm:$0xff] }
  0x26   : > { %2323 = vmatprep.subr.bf16.mxu0 %v2536_v2 }
  0x29   : > { %2324 = vmatpush3.bf16.msra.mxu0 %v2536_v2 }
  0x2c   : > { %2326 = vmatmul.mubr.msk.bf16.vlgmr.msra.gmra.mxu0 %vm666_vm0, %v2538_v4 }
  0xec   : > { %v2327_v6 = vpop.f32.mrf.mxu0 }
  0xed   : > { %v716_v8 = vadd.f32 %v2327_v6, %v639_v5 }
  0xee   : > { %v707_v9 = vpop.f32.mrf.mxu0 }
  0xef   : > { %v708_v10 = vadd.f32 %v707_v9, %v637_v7  ;;  %v731_v11 = vsel %vm730_vm1, %v716_v8, 0.0 }
  0xf0   : > { %732 = vadd.xlane.f32.xlu1 %v731_v11  ;;  %v2328_v12 = vpop.f32.mrf.mxu0 }
  0xf1   : > { %v724_v14 = vsel %vm723_vm2, %v708_v10, 0.0 }
  0xf2   : > { %v710_v15 = vpop.f32.mrf.mxu0  ;;  %725 = vadd.xlane.f32.xlu0 %v724_v14 }
  0xf3   : > { %v711_v16 = vadd.f32 %v710_v15, %v638_v13 }
  0xf5   : > { %v727_v17 = vsel %vm723_vm2, %v711_v16, 0.0 }
  0xf6   : > { %728 = vadd.xlane.f32.xlu0 %v727_v17 }
 0x179   : > { %v733_v18 = vpop.xlane.xlu1 %732 }
 0x17a   : > { %v737_v19 = vmul.f32 0.03125, %v733_v18 }
 0x17b   : > { %v726_v20 = vpop.xlane.xlu0 %725 }
 0x17c   : > { %v735_v21 = vmul.f32 0.03125, %v726_v20  ;;  %v740_v22 = vsub.f32 %v716_v8, %v737_v19 }
 0x17e   : > { %v738_v23 = vsub.f32 %v708_v10, %v735_v21  ;;  %v743_v29 = vmul.f32 %v740_v22, %v740_v22 }
 0x17f   : > { %v729_v24 = vpop.xlane.xlu0 %728 }
 0x180   : > { %v736_v25 = vmul.f32 0.03125, %v729_v24  ;;  %v741_v26 = vmul.f32 %v738_v23, %v738_v23  ;;  %v750_v31 = vsel %vm730_vm1, %v743_v29, 0.0 }
 0x182   : > { %v739_v27 = vsub.f32 %v711_v16, %v736_v25  ;;  %v744_v28 = vsel %vm723_vm2, %v741_v26, 0.0 }
 0x183   : > { %745 = vadd.xlane.f32.xlu1 %v744_v28 }
 0x184   : > { %v742_v30 = vmul.f32 %v739_v27, %v739_v27 }
 0x186   : > { %v747_v32 = vsel %vm723_vm2, %v742_v30, 0.0 }
 0x187   : > { %751 = vadd.xlane.f32.xlu1 %v750_v31  ;;  %748 = vadd.xlane.f32.xlu0 %v747_v32 }
 0x20c   : > { %v746_v33 = vpop.xlane.xlu1 %745 }
 0x20d   : > { %v753_v34 = vmul.f32 0.03125, %v746_v33 }
 0x20f   : > { %v756_v35 = vadd.f32 1e-05, %v753_v34 }
 0x210   : > { %v752_v36 = vpop.xlane.xlu1 %751  ;;  %v749_v37 = vpop.xlane.xlu0 %748 }
 0x211   : > { %2539 = vrsqrt.f32 %v756_v35  ;;  %v755_v38 = vmul.f32 0.03125, %v752_v36  ;;  %v754_v39 = vmul.f32 0.03125, %v749_v37 }
 0x213   : > { %v758_v40 = vadd.f32 1e-05, %v755_v38  ;;  %v757_v41 = vadd.f32 1e-05, %v754_v39 }
 0x215   : > { %2541 = vrsqrt.f32 %v758_v40 }
 0x216   : > { %2543 = vrsqrt.f32 %v757_v41 }
 0x21e   : > { %v2540_v42 = vpop.eup %2539 }
 0x21f   : > { %v762_v44 = vmul.f32 %v2540_v42, %v738_v23 }
 0x221   : > { %v771_v46 = vmul.f32 %v2198_v43, %v762_v44 }
 0x222   : > { %v2542_v47 = vpop.eup %2541 }
 0x223   : > { %v2544_v48 = vpop.eup %2543  ;;  %v780_v49 = vadd.f32 %v2199_v45, %v771_v46   ;;  %v764_v50 = vmul.f32 %v2542_v47, %v740_v22 }
 0x224   : > { %v763_v51 = vmul.f32 %v2544_v48, %v739_v27 }
 0x225   : > { %v773_v52 = vmul.f32 %v2198_v43, %v764_v50 }
 0x226   : > { %v772_v53 = vmul.f32 %v2198_v43, %v763_v51 }
 0x227   : > { %v782_v54 = vadd.f32 %v2199_v45, %v773_v52  }
 0x228   : > { %v781_v55 = vadd.f32 %v2199_v45, %v772_v53  }
 0x229 LB: >> { %v796_v56 = vsel %vm723_vm2, %v2734_v49, 0.0  ;;  %v802_v57 = vsel %vm730_vm1, %v2726_v54, 0.0  ;;  %v799_v58 = vsel %vm723_vm2, %v2730_v55, 0.0  ;;  %s2984_s1 = sshll.u32 %s2738_s28, 4  ;;  %s3304_s5 = sld [smem:[#allocation16_spill]]  ;;  %vm944_vm3 = vcmask 64512   ;;  %s2738_s28 = sphi %s2957_s28, %s788_s28   ;;  %v2734_v49 = vphi %v780_v49, %v3305_v49   ;;  %v2730_v55 = vphi %v781_v55, %v2008_v55   ;;  %v2726_v54 = vphi %v782_v54, %v2009_v54  }
 0x22a   : >> { %797 = vadd.xlane.f32.xlu0 %v796_v56  ;;  %803 = vadd.xlane.f32.xlu1 %v802_v57  ;;  %s857_s29 = scalar_lea.vmem %s3259_s7, %s2984_s1  ;;  %s794_s3 = scalar_lea.vmem %s3258_s6, %s2738_s28  ;;  %vm1005_vm4 = vcmask 138240   ;;  %vm1012_vm5 = vcmask 131072   ;;  %vm1053_vm6 = vcmask 1040384   ;;  %vm1641_vm7 = vcmask 130048  }
 0x22b   : >> { %v2560_v10 = vld [vmem:[%s857_s29 + $0x8] sm:$0xff]   ;;  %v2561_v11 = vld [vmem:[%s857_s29] sm:$0xff]   ;;  %s862_s30 = scalar_lea.vmem %s3260_s8, %s2738_s28  ;;  %s2740_s0 = smov 96   ;;  %vm1645_vm8 = vcmask 195584   ;;  %vm1941_vm9 = vcmask 523264  }
 0x22c   : >> { %2329 = vmatprep.subr.bf16.mxu0 %v2560_v10  ;;  %v2201_v28 = vld [vmem:[%s794_s3] ss:$0 sm:$0xff]  ;;  %s2742_s26 = smov 120   ;;  %s2743_s27 = smov 88  }
 0x22d   : >> { %2330 = vmatpush3.bf16.msra.mxu0 %v2560_v10  ;;  %v2204_v37 = vld [vmem:[%s862_s30] ss:$0 sm:$0xff]  ;;  %s2745_s3 = smov 56   ;;  %s2746_s24 = smov 80  }
 0x22e   : >> { %800 = vadd.xlane.f32.xlu0 %v799_v58  ;;  %2331 = vmatprep.subr.bf16.mxu0 %v2561_v11  ;;  %s2747_s29 = smov 112   ;;  %s2748_s30 = smov 48  }
 0x22f   : >> { %s792_s21 = scalar_lea.vmem %s3304_s5, %s2738_s28 }
 0x230   : >> { %v2200_v23 = vld [vmem:[%s792_s21] ss:$0 sm:$0xff]  ;;  %s2741_s21 = smov 64  }
 0x231   : >> { %2332 = vmatpush3.bf16.msra.mxu0 %v2561_v11 }
 0x2b3   : >> { %v798_v59 = vpop.xlane.xlu0 %797  ;;  %v804_v60 = vpop.xlane.xlu1 %803 }
 0x2b4   : >> { %v805_v61 = vmul.f32 0.03125, %v798_v59  ;;  %v807_v62 = vmul.f32 0.03125, %v804_v60 }
 0x2b6   : >> { %v808_v63 = vsub.f32 %v2734_v49, %v805_v61  ;;  %v810_v0 = vsub.f32 %v2726_v54, %v807_v62 }
 0x2b7   : >> { %v801_v1 = vpop.xlane.xlu0 %800 }
 0x2b8   : >> { %v806_v2 = vmul.f32 0.03125, %v801_v1  ;;  %v811_v3 = vmul.f32 %v808_v63, %v808_v63  ;;  %v813_v4 = vmul.f32 %v810_v0, %v810_v0 }
 0x2ba   : >> { %v809_v5 = vsub.f32 %v2730_v55, %v806_v2  ;;  %v814_v6 = vsel %vm723_vm2, %v811_v3, 0.0  ;;  %v820_v8 = vsel %vm730_vm1, %v813_v4, 0.0 }
 0x2bb   : >> { %815 = vadd.xlane.f32.xlu1 %v814_v6 }
 0x2bc   : >> { %v812_v7 = vmul.f32 %v809_v5, %v809_v5 }
 0x2be   : >> { %v817_v9 = vsel %vm723_vm2, %v812_v7, 0.0 }
 0x2bf   : >> { %818 = vadd.xlane.f32.xlu0 %v817_v9  ;;  %821 = vadd.xlane.f32.xlu1 %v820_v8 }
 0x344   : >> { %v816_v12 = vpop.xlane.xlu1 %815 }
 0x345   : >> { %v823_v13 = vmul.f32 0.03125, %v816_v12 }
 0x347   : >> { %v826_v14 = vadd.f32 1e-05, %v823_v13  ;;  %v2744_v13 = vmov 0  }
 0x348   : >> { %v819_v15 = vpop.xlane.xlu0 %818  ;;  %v822_v16 = vpop.xlane.xlu1 %821 }
 0x349   : >> { %2570 = vrsqrt.f32 %v826_v14  ;;  %v824_v17 = vmul.f32 0.03125, %v819_v15  ;;  %v825_v18 = vmul.f32 0.03125, %v822_v16  ;;  %v3030_v14 = vsel %vm1053_vm6, 65535, %v2744_v13 }
 0x34b   : >> { %v827_v19 = vadd.f32 1e-05, %v824_v17  ;;  %v828_v20 = vadd.f32 1e-05, %v825_v18 }
 0x34d   : >> { %2572 = vrsqrt.f32 %v827_v19 }
 0x34e   : >> { %2574 = vrsqrt.f32 %v828_v20 }
 0x356   : >> { %v2571_v21 = vpop.eup %2570 }
 0x357   : >> { %v832_v22 = vmul.f32 %v2571_v21, %v808_v63 }
 0x359   : >> { %v841_v27 = vmul.f32 %v2200_v23, %v832_v22 }
 0x35a   : >> { %v2573_v24 = vpop.eup %2572 }
 0x35b   : >> { %v2575_v25 = vpop.eup %2574  ;;  %v833_v26 = vmul.f32 %v2573_v24, %v809_v5  ;;  %v850_v32 = vadd.f32 %v2201_v28, %v841_v27 }
 0x35c   : >> { %v834_v29 = vmul.f32 %v2575_v25, %v810_v0 }
 0x35d   : >> { %v842_v30 = vmul.f32 %v2200_v23, %v833_v26 }
 0x35e   : >> { %v843_v31 = vmul.f32 %v2200_v23, %v834_v29 }
 0x35f   : >> { %v851_v33 = vadd.f32 %v2201_v28, %v842_v30 }
 0x360   : >> { %v852_v34 = vadd.f32 %v2201_v28, %v843_v31 }
 0x361   : >> { %v853_v35 = vpack.c.bf16 %v851_v33, %v850_v32 }
 0x362   : >> { %v854_v36 = vpack.c.bf16 %v852_v34, %v852_v34 }
 0x363   : >> { %2333 = vmatprep.mubr.msk.bf16.mxu0 %vm723_vm2, %v853_v35 }
 0x364   : >> { %2334 = vmatmul.mubr.msk.bf16.vlgmr.msra.gmra.mxu0 %vm723_vm2, %v854_v36 }
 0x424   : >> { %v2335_v38 = vpop.f32.mrf.mxu0 }
 0x425   : >> { %v931_v39 = vadd.f32 %v2335_v38, %v2204_v37 }
 0x426   : >> { %v922_v40 = vpop.f32.mrf.mxu0 }
 0x427   : >> { %v3004_v41 = vpack.c.bf16 %v931_v39, %v931_v39  ;;  %v923_v44 = vadd.f32 %v2204_v37, %v922_v40 }
 0x428   : >> { %v2336_v42 = vpop.f32.mrf.mxu0 }
 0x429   : >> { %942 = vrot.lane.b32.xlu0 %v3004_v41, %s2740_s0 }
 0x42a   : >> { %v925_v43 = vpop.f32.mrf.mxu0 }
 0x42b   : >> { %v926_v45 = vadd.f32 %v2204_v37, %v925_v43 }
 0x42d   : >> { %v3007_v46 = vpack.c.bf16 %v926_v45, %v923_v44 }
 0x42f   : >> { %940 = vrot.lane.b32.xlu1 %v3007_v46, %s2740_s0  ;;  %2341 = vmatprep.mubr.msk.bf16.mxu1 %vm944_vm3, %v3007_v46  ;;  %s2749_s0 = smov 72  }
 0x49b   : >> { %v943_v47 = vpop.permute.xlu0 %942 }
 0x49c   : >> { %2437 = vmatprep.subr.msk.bf16.mxu1 %vm944_vm3, %v943_v47  ;;  %v955_v48 = vsel %vm944_vm3, %v943_v47, 0 }
 0x49d   : >> { %2338 = vmatpush3.bf16.xpose.msra.mxu1 %v955_v48 }
 0x4a1   : >> { %v941_v50 = vpop.permute.xlu1 %940 }
 0x4a2   : >> { %2438 = vmatprep.subr.msk.bf16.mxu1 %vm944_vm3, %v941_v50  ;;  %v952_v51 = vsel %vm944_vm3, %v941_v50, 0 }
 0x4a5   : >> { %2340 = vmatpush3.bf16.xpose.msra.mxu1 %v952_v51 }
 0x4ac   : >> { %2342 = vmatmul.mubr.msk.bf16.vlgmr.msra.gmra.mxu1 %vm944_vm3, %v3004_v41 }
 0x56c   : >> { %v2343_v52 = vpop.f32.mrf.mxu1 }
 0x56d   : >> { %v1013_v60 = vsel %vm1012_vm5, %v2343_v52, -inf }
 0x56e   : >> { %v991_v53 = vpop.f32.mrf.mxu1 }
 0x56f   : >> { %v1006_v56 = vsel %vm1005_vm4, %v991_v53, -inf }
 0x570   : >> { %1007 = vmax.xlane.f32.xlu1 %v1006_v56  ;;  %v2344_v57 = vpop.f32.mrf.mxu1 }
 0x572   : >> { %v994_v58 = vpop.f32.mrf.mxu1 }
 0x573   : >> { %v1009_v59 = vsel %vm1005_vm4, %v994_v58, -inf }
 0x574   : >> { %1010 = vmax.xlane.f32.xlu0 %v1009_v59 }
 0x578   : >> { %1014 = vmax.xlane.f32.xlu0 %v1013_v60 }
 0x5f9   : >> { %v1008_v61 = vpop.xlane.xlu1 %1007 }
 0x5fa   : >> { %v1016_v0 = vsub.f32 %v991_v53, %v1008_v61 }
 0x5fc   : >> { %v1019_v4 = vmul.f32 1.442695, %v1016_v0 }
 0x5fd   : >> { %v1011_v62 = vpop.xlane.xlu0 %1010 }
 0x5fe   : >> { %v1017_v63 = vsub.f32 %v994_v58, %v1011_v62 }
 0x600   : >> { %v1021_v1 = vmul.f32 1.442695, %v1017_v63 }
 0x601   : >> { %v1015_v2 = vpop.xlane.xlu0 %1014 }
 0x602   : >> { %2576 = vpow2.f32 %v1021_v1  ;;  %v1018_v3 = vsub.f32 %v2343_v52, %v1015_v2 }
 0x604   : >> { %v1023_v5 = vmul.f32 1.442695, %v1018_v3 }
 0x606   : >> { %2578 = vpow2.f32 %v1023_v5 }
 0x607   : >> { %2580 = vpow2.f32 %v1019_v4 }
 0x60f   : >> { %v2577_v6 = vpop.eup %2576 }
 0x610   : >> { %v1028_v7 = vsel %vm1005_vm4, %v2577_v6, 0.0 }
 0x611   : >> { %1029 = vadd.xlane.f32.xlu0 %v1028_v7 }
 0x613   : >> { %v2579_v8 = vpop.eup %2578 }
 0x614   : >> { %v1031_v9 = vsel %vm1012_vm5, %v2579_v8, 0.0  ;;  %v2581_v10 = vpop.eup %2580 }
 0x615   : >> { %1032 = vadd.xlane.f32.xlu1 %v1031_v9  ;;  %v1025_v11 = vsel %vm1005_vm4, %v2581_v10, 0.0 }
 0x619   : >> { %1026 = vadd.xlane.f32.xlu1 %v1025_v11 }
 0x627   : >> { %1044 = vrot.lane.b32.xlu0 %v3004_v41, %s2741_s21 }
 0x62a   : >> { %1042 = vrot.lane.b32.xlu1 %v3007_v46, %s2741_s21  ;;  %s2750_s21 = smov 104  }
 0x62b   : >> { %1107 = vrot.lane.b32.xlu0 %v3007_v46, %s2742_s26 }
 0x62e   : >> { %1113 = vrot.lane.b32.xlu1 %v3004_v41, %s2743_s27 }
 0x632   : >> { %1111 = vrot.lane.b32.xlu1 %v3007_v46, %s2743_s27  ;;  %s2752_s27 = smov 8  }
 0x636   : >> { %1109 = vrot.lane.b32.xlu1 %v3004_v41, %s2742_s26  ;;  %s2751_s26 = smov 40  }
 0x69a   : >> { %v1030_v12 = vpop.xlane.xlu0 %1029 }
 0x69e   : >> { %v1033_v15 = vpop.xlane.xlu1 %1032  ;;  %v1045_v16 = vpop.permute.xlu0 %1044 }
 0x69f   : >> { %v1057_v17 = vand.u32 %v3030_v14, %v1045_v16  ;;  %2582 = vrcp.f32 %v1033_v15 }
 0x6a0   : >> { %2584 = vrcp.f32 %v1030_v12 }
 0x6a1   : >> { %2345 = vmatprep.subr.bf16.mxu0 %v1057_v17 }
 0x6a2   : >> { %v1027_v18 = vpop.xlane.xlu1 %1026  ;;  %2346 = vmatpush3.bf16.msra.mxu0 %v1057_v17  ;;  %v1108_v29 = vpop.permute.xlu0 %1107 }
 0x6a3   : >> { %2586 = vrcp.f32 %v1027_v18 }
 0x6a6   : >> { %v1043_v19 = vpop.permute.xlu1 %1042 }
 0x6a7   : >> { %2347 = vmatprep.subr.bf16.mxu0 %v1043_v19 }
 0x6a8   : >> { %2348 = vmatpush3.bf16.msra.mxu0 %v1043_v19 }
 0x6aa   : >> { %v1114_v20 = vpop.permute.xlu1 %1113 }
 0x6ab   : >> { %2439 = vmatprep.subr.msk.bf16.mxu0 %vm944_vm3, %v1114_v20  ;;  %v1125_v30 = vsel %vm944_vm3, %v1114_v20, 0 }
 0x6ac   : >> { %v2583_v21 = vpop.eup %2582 }
 0x6ad   : >> { %v2585_v22 = vpop.eup %2584  ;;  %v1039_v24 = vmul.f32 %v2583_v21, %v2579_v8 }
 0x6ae   : >> { %v1038_v26 = vmul.f32 %v2585_v22, %v2577_v6  ;;  %v1112_v31 = vpop.permute.xlu1 %1111 }
 0x6af   : >> { %v1041_v28 = vpack.c.bf16 %v1039_v24, %v1039_v24  ;;  %v1122_v32 = vsel %vm944_vm3, %v1112_v31, 0 }
 0x6b0   : >> { %v2587_v23 = vpop.eup %2586 }
 0x6b1   : >> { %v1037_v25 = vmul.f32 %v2587_v23, %v2581_v10 }
 0x6b2   : >> { %v1110_v33 = vpop.permute.xlu1 %1109 }
 0x6b3   : >> { %v1040_v27 = vpack.c.bf16 %v1038_v26, %v1037_v25 }
 0x6b5   : >> { %2349 = vmatprep.mubr.msk.bf16.mxu0 %vm1005_vm4, %v1040_v27 }
 0x6b6   : >> { %2350 = vmatmul.mubr.msk.bf16.vlgmr.msra.gmra.mxu0 %vm1005_vm4, %v1041_v28 }
 0x6b7   : >> { %2354 = vmatpush3.bf16.xpose.msra.mxu0 %v1125_v30  ;;  %2357 = vmatprep.mubr.msk.bf16.mxu0 %vm944_vm3, %v1108_v29 }
 0x6b8   : >> { %2440 = vmatprep.subr.msk.bf16.mxu0 %vm944_vm3, %v1112_v31 }
 0x6bf   : >> { %2356 = vmatpush3.bf16.xpose.msra.mxu0 %v1122_v32 }
 0x6c6   : >> { %2358 = vmatmul.mubr.msk.bf16.vlgmr.msra.gmra.mxu0 %vm944_vm3, %v1110_v33 }
 0x776   : >> { %v3041_v34 = vpop.f32.mrf.mxu0 }
 0x778   : >> { %v3043_v35 = vpop.f32.mrf.mxu0 }
 0x77a   : >> { %v2352_v36 = vpop.f32.mrf.mxu0 }
 0x77c   : >> { %v3045_v37 = vpop.f32.mrf.mxu0 }
 0x786   : >> { %v2359_v38 = vpop.f32.mrf.mxu0 }
 0x787   : >> { %v1181_v44 = vsel %vm1012_vm5, %v2359_v38, -inf }
 0x788   : >> { %v1161_v39 = vpop.f32.mrf.mxu0 }
 0x789   : >> { %v1175_v40 = vsel %vm1005_vm4, %v1161_v39, -inf }
 0x78a   : >> { %1176 = vmax.xlane.f32.xlu0 %v1175_v40  ;;  %v2360_v42 = vpop.f32.mrf.mxu0 }
 0x78c   : >> { %v1164_v43 = vpop.f32.mrf.mxu0 }
 0x78d   : >> { %v1178_v45 = vsel %vm1005_vm4, %v1164_v43, -inf }
 0x78e   : >> { %1182 = vmax.xlane.f32.xlu0 %v1181_v44  ;;  %1179 = vmax.xlane.f32.xlu1 %v1178_v45 }
 0x813   : >> { %v1177_v47 = vpop.xlane.xlu0 %1176 }
 0x814   : >> { %v1184_v48 = vsub.f32 %v1161_v39, %v1177_v47 }
 0x816   : >> { %v1187_v50 = vmul.f32 1.442695, %v1184_v48 }
 0x817   : >> { %v1183_v51 = vpop.xlane.xlu0 %1182  ;;  %v1180_v52 = vpop.xlane.xlu1 %1179 }
 0x818   : >> { %2588 = vpow2.f32 %v1187_v50  ;;  %v1186_v53 = vsub.f32 %v2359_v38, %v1183_v51  ;;  %v1185_v56 = vsub.f32 %v1164_v43, %v1180_v52 }
 0x81a   : >> { %v1191_v57 = vmul.f32 1.442695, %v1186_v53  ;;  %v1189_v58 = vmul.f32 1.442695, %v1185_v56 }
 0x81c   : >> { %2590 = vpow2.f32 %v1191_v57 }
 0x81d   : >> { %2592 = vpow2.f32 %v1189_v58 }
 0x825   : >> { %v2589_v59 = vpop.eup %2588 }
 0x826   : >> { %v1193_v60 = vsel %vm1005_vm4, %v2589_v59, 0.0 }
 0x827   : >> { %1194 = vadd.xlane.f32.xlu0 %v1193_v60 }
 0x829   : >> { %v2591_v61 = vpop.eup %2590 }
 0x82a   : >> { %v2593_v62 = vpop.eup %2592  ;;  %v1199_v63 = vsel %vm1012_vm5, %v2591_v61, 0.0 }
 0x82b   : >> { %1200 = vadd.xlane.f32.xlu1 %v1199_v63  ;;  %v1196_v0 = vsel %vm1005_vm4, %v2593_v62, 0.0 }
 0x82c   : >> { %1197 = vadd.xlane.f32.xlu0 %v1196_v0 }
 0x83c   : >> { %1210 = vrot.lane.b32.xlu1 %v3007_v46, %s2745_s3 }
 0x840   : >> { %1278 = vrot.lane.b32.xlu1 %v3004_v41, %s2746_s24 }
 0x842   : >> { %1212 = vrot.lane.b32.xlu0 %v3004_v41, %s2745_s3  ;;  %s2753_s3 = smov 16  }
 0x844   : >> { %1276 = vrot.lane.b32.xlu1 %v3007_v46, %s2746_s24 }
 0x846   : >> { %1272 = vrot.lane.b32.xlu0 %v3007_v46, %s2747_s29 }
 0x848   : >> { %1274 = vrot.lane.b32.xlu1 %v3004_v41, %s2747_s29  ;;  %s1801_s29 = scalar_lea.vmem %s3265_s13, %s2984_s1 }
 0x8b0   : >> { %v1195_v1 = vpop.xlane.xlu0 %1194 }
 0x8b1   : >> { %2594 = vrcp.f32 %v1195_v1 }
 0x8b4   : >> { %v1201_v2 = vpop.xlane.xlu1 %1200 }
 0x8b5   : >> { %v1198_v3 = vpop.xlane.xlu0 %1197  ;;  %2596 = vrcp.f32 %v1201_v2 }
 0x8b6   : >> { %2598 = vrcp.f32 %v1198_v3 }
 0x8b8   : >> { %v1211_v6 = vpop.permute.xlu1 %1210 }
 0x8b9   : >> { %v1213_v4 = vpop.permute.xlu0 %1212 }
 0x8ba   : >> { %v1222_v5 = vand.u32 %v1213_v4, %v3030_v14 }
 0x8bc   : >> { %2361 = vmatprep.subr.bf16.mxu1 %v1222_v5  ;;  %v1279_v8 = vpop.permute.xlu1 %1278 }
 0x8bd   : >> { %2362 = vmatpush3.bf16.msra.mxu1 %v1222_v5  ;;  %v1273_v17 = vpop.permute.xlu0 %1272  ;;  %v1290_v18 = vsel %vm944_vm3, %v1279_v8, 0 }
 0x8be   : >> { %2363 = vmatprep.subr.bf16.mxu1 %v1211_v6  ;;  %v2595_v7 = vpop.eup %2594 }
 0x8bf   : >> { %v1205_v12 = vmul.f32 %v2595_v7, %v2589_v59 }
 0x8c0   : >> { %v1277_v19 = vpop.permute.xlu1 %1276 }
 0x8c1   : >> { %2364 = vmatpush3.bf16.msra.mxu1 %v1211_v6  ;;  %v1287_v20 = vsel %vm944_vm3, %v1277_v19, 0 }
 0x8c2   : >> { %v2597_v9 = vpop.eup %2596  ;;  %2441 = vmatprep.subr.msk.bf16.mxu1 %vm944_vm3, %v1279_v8 }
 0x8c3   : >> { %v2599_v10 = vpop.eup %2598  ;;  %v1207_v11 = vmul.f32 %v2597_v9, %v2591_v61 }
 0x8c4   : >> { %v1206_v13 = vmul.f32 %v2599_v10, %v2593_v62  ;;  %v1275_v21 = vpop.permute.xlu1 %1274 }
 0x8c5   : >> { %v1209_v15 = vpack.c.bf16 %v1207_v11, %v1207_v11 }
 0x8c6   : >> { %v1208_v16 = vpack.c.bf16 %v1206_v13, %v1205_v12 }
 0x8c8   : >> { %2365 = vmatprep.mubr.msk.bf16.mxu1 %vm1005_vm4, %v1208_v16 }
 0x8c9   : >> { %2366 = vmatmul.mubr.msk.bf16.vlgmr.msra.gmra.mxu1 %vm1005_vm4, %v1209_v15 }
 0x8ca   : >> { %2370 = vmatpush3.bf16.xpose.msra.mxu1 %v1290_v18  ;;  %2373 = vmatprep.mubr.msk.bf16.mxu1 %vm944_vm3, %v1273_v17 }
 0x8cb   : >> { %2442 = vmatprep.subr.msk.bf16.mxu1 %vm944_vm3, %v1277_v19 }
 0x8d2   : >> { %2372 = vmatpush3.bf16.xpose.msra.mxu1 %v1287_v20 }
 0x8d9   : >> { %2374 = vmatmul.mubr.msk.bf16.vlgmr.msra.gmra.mxu1 %vm944_vm3, %v1275_v21 }
 0x989   : >> { %v3068_v22 = vpop.f32.mrf.mxu1 }
 0x98b   : >> { %v3070_v23 = vpop.f32.mrf.mxu1 }
 0x98d   : >> { %v2368_v24 = vpop.f32.mrf.mxu1 }
 0x98f   : >> { %v3072_v25 = vpop.f32.mrf.mxu1 }
 0x990   : >> { %v2545_v26 = vpack.i.bf16 %v3072_v25, %v3070_v23 }
 0x999   : >> { %v2375_v27 = vpop.f32.mrf.mxu1 }
 0x99a   : >> { %v1346_v32 = vsel %vm1012_vm5, %v2375_v27, -inf }
 0x99b   : >> { %v1326_v28 = vpop.f32.mrf.mxu1 }
 0x99c   : >> { %v1340_v29 = vsel %vm1005_vm4, %v1326_v28, -inf }
 0x99d   : >> { %1341 = vmax.xlane.f32.xlu0 %v1340_v29  ;;  %v2376_v30 = vpop.f32.mrf.mxu1 }
 0x99f   : >> { %v1329_v31 = vpop.f32.mrf.mxu1 }
 0x9a0   : >> { %v1343_v33 = vsel %vm1005_vm4, %v1329_v31, -inf }
 0x9a1   : >> { %1347 = vmax.xlane.f32.xlu0 %v1346_v32  ;;  %1344 = vmax.xlane.f32.xlu1 %v1343_v33 }
 0xa26   : >> { %v1342_v36 = vpop.xlane.xlu0 %1341 }
 0xa27   : >> { %v1349_v38 = vsub.f32 %v1326_v28, %v1342_v36 }
 0xa29   : >> { %v1352_v39 = vmul.f32 1.442695, %v1349_v38 }
 0xa2a   : >> { %v1348_v40 = vpop.xlane.xlu0 %1347  ;;  %v1345_v42 = vpop.xlane.xlu1 %1344 }
 0xa2b   : >> { %2600 = vpow2.f32 %v1352_v39  ;;  %v1351_v43 = vsub.f32 %v2375_v27, %v1348_v40  ;;  %v1350_v44 = vsub.f32 %v1329_v31, %v1345_v42 }
 0xa2d   : >> { %v1356_v45 = vmul.f32 1.442695, %v1351_v43  ;;  %v1354_v47 = vmul.f32 1.442695, %v1350_v44 }
 0xa2f   : >> { %2602 = vpow2.f32 %v1356_v45 }
 0xa30   : >> { %2604 = vpow2.f32 %v1354_v47 }
 0xa38   : >> { %v2601_v48 = vpop.eup %2600 }
 0xa39   : >> { %v1358_v50 = vsel %vm1005_vm4, %v2601_v48, 0.0 }
 0xa3a   : >> { %1359 = vadd.xlane.f32.xlu0 %v1358_v50 }
 0xa3c   : >> { %v2603_v51 = vpop.eup %2602 }
 0xa3d   : >> { %v2605_v52 = vpop.eup %2604  ;;  %v1364_v53 = vsel %vm1012_vm5, %v2603_v51, 0.0 }
 0xa3e   : >> { %1365 = vadd.xlane.f32.xlu1 %v1364_v53  ;;  %v1361_v56 = vsel %vm1005_vm4, %v2605_v52, 0.0 }
 0xa3f   : >> { %1362 = vadd.xlane.f32.xlu0 %v1361_v56 }
 0xa4f   : >> { %1375 = vrot.lane.b32.xlu1 %v3007_v46, %s2748_s30 }
 0xa53   : >> { %1443 = vrot.lane.b32.xlu1 %v3004_v41, %s2749_s0 }
 0xa55   : >> { %1377 = vrot.lane.b32.xlu0 %v3004_v41, %s2748_s30  ;;  %s1652_s30 = scalar_lea.vmem %s3261_s9, %s2984_s1 }
 0xa57   : >> { %1441 = vrot.lane.b32.xlu1 %v3007_v46, %s2749_s0  ;;  %s2754_s0 = smov 24  }
 0xa59   : >> { %1437 = vrot.lane.b32.xlu0 %v3007_v46, %s2750_s21 }
 0xa5b   : >> { %1439 = vrot.lane.b32.xlu1 %v3004_v41, %s2750_s21  ;;  %s1806_s21 = scalar_lea.vmem %s3266_s14, %s2738_s28 }
 0xac3   : >> { %v1360_v57 = vpop.xlane.xlu0 %1359 }
 0xac4   : >> { %2606 = vrcp.f32 %v1360_v57 }
 0xac7   : >> { %v1366_v58 = vpop.xlane.xlu1 %1365 }
 0xac8   : >> { %v1363_v59 = vpop.xlane.xlu0 %1362  ;;  %2608 = vrcp.f32 %v1366_v58 }
 0xac9   : >> { %2610 = vrcp.f32 %v1363_v59 }
 0xacb   : >> { %v1376_v62 = vpop.permute.xlu1 %1375 }
 0xacc   : >> { %v1378_v60 = vpop.permute.xlu0 %1377 }
 0xacd   : >> { %v1387_v61 = vand.u32 %v1378_v60, %v3030_v14 }
 0xacf   : >> { %2377 = vmatprep.subr.bf16.mxu0 %v1387_v61  ;;  %v1444_v0 = vpop.permute.xlu1 %1443 }
 0xad0   : >> { %2378 = vmatpush3.bf16.msra.mxu0 %v1387_v61  ;;  %v1438_v8 = vpop.permute.xlu0 %1437  ;;  %v1455_v9 = vsel %vm944_vm3, %v1444_v0, 0  ;;  %v2563_v61 = vld [vmem:[%s1652_s30] sm:$0xff]  }
 0xad1   : >> { %2379 = vmatprep.subr.bf16.mxu0 %v1376_v62  ;;  %v2607_v63 = vpop.eup %2606 }
 0xad2   : >> { %v1370_v4 = vmul.f32 %v2607_v63, %v2601_v48 }
 0xad3   : >> { %v1442_v10 = vpop.permute.xlu1 %1441 }
 0xad4   : >> { %2380 = vmatpush3.bf16.msra.mxu0 %v1376_v62  ;;  %v1452_v11 = vsel %vm944_vm3, %v1442_v10, 0 }
 0xad5   : >> { %v2609_v1 = vpop.eup %2608  ;;  %2443 = vmatprep.subr.msk.bf16.mxu0 %vm944_vm3, %v1444_v0 }
 0xad6   : >> { %v2611_v2 = vpop.eup %2610  ;;  %v1372_v3 = vmul.f32 %v2609_v1, %v2603_v51 }
 0xad7   : >> { %v1371_v5 = vmul.f32 %v2611_v2, %v2605_v52  ;;  %v1440_v12 = vpop.permute.xlu1 %1439 }
 0xad8   : >> { %v1374_v6 = vpack.c.bf16 %v1372_v3, %v1372_v3 }
 0xad9   : >> { %v1373_v7 = vpack.c.bf16 %v1371_v5, %v1370_v4 }
 0xadb   : >> { %2381 = vmatprep.mubr.msk.bf16.mxu0 %vm1005_vm4, %v1373_v7 }
 0xadc   : >> { %2382 = vmatmul.mubr.msk.bf16.vlgmr.msra.gmra.mxu0 %vm1005_vm4, %v1374_v6 }
 0xadd   : >> { %2386 = vmatpush3.bf16.xpose.msra.mxu0 %v1455_v9  ;;  %2389 = vmatprep.mubr.msk.bf16.mxu0 %vm944_vm3, %v1438_v8 }
 0xade   : >> { %2444 = vmatprep.subr.msk.bf16.mxu0 %vm944_vm3, %v1442_v10 }
 0xae5   : >> { %2388 = vmatpush3.bf16.xpose.msra.mxu0 %v1452_v11 }
 0xaec   : >> { %2390 = vmatmul.mubr.msk.bf16.vlgmr.msra.gmra.mxu0 %vm944_vm3, %v1440_v12 }
 0xb9c   : >> { %v2383_v13 = vpop.f32.mrf.mxu0 }
 0xb9e   : >> { %v1423_v15 = vpop.f32.mrf.mxu0 }
 0xba0   : >> { %v2384_v16 = vpop.f32.mrf.mxu0 }
 0xba2   : >> { %v1426_v17 = vpop.f32.mrf.mxu0 }
 0xba3   : >> { %v2550_v18 = vpack.i.bf16 %v1426_v17, %v1423_v15 }
 0xbac   : >> { %v2391_v19 = vpop.f32.mrf.mxu0 }
 0xbad   : >> { %v1511_v28 = vsel %vm1012_vm5, %v2391_v19, -inf }
 0xbae   : >> { %v1491_v20 = vpop.f32.mrf.mxu0 }
 0xbaf   : >> { %v1505_v21 = vsel %vm1005_vm4, %v1491_v20, -inf }
 0xbb0   : >> { %1506 = vmax.xlane.f32.xlu0 %v1505_v21  ;;  %v2392_v24 = vpop.f32.mrf.mxu0 }
 0xbb2   : >> { %v1494_v27 = vpop.f32.mrf.mxu0 }
 0xbb3   : >> { %v1508_v29 = vsel %vm1005_vm4, %v1494_v27, -inf }
 0xbb4   : >> { %1512 = vmax.xlane.f32.xlu0 %v1511_v28  ;;  %1509 = vmax.xlane.f32.xlu1 %v1508_v29 }
 0xc39   : >> { %v1507_v30 = vpop.xlane.xlu0 %1506 }
 0xc3a   : >> { %v1514_v31 = vsub.f32 %v1491_v20, %v1507_v30 }
 0xc3c   : >> { %v1517_v32 = vmul.f32 1.442695, %v1514_v31 }
 0xc3d   : >> { %v1513_v33 = vpop.xlane.xlu0 %1512  ;;  %v1510_v36 = vpop.xlane.xlu1 %1509 }
 0xc3e   : >> { %2612 = vpow2.f32 %v1517_v32  ;;  %v1516_v38 = vsub.f32 %v2391_v19, %v1513_v33  ;;  %v1515_v39 = vsub.f32 %v1494_v27, %v1510_v36 }
 0xc40   : >> { %v1521_v40 = vmul.f32 1.442695, %v1516_v38  ;;  %v1519_v42 = vmul.f32 1.442695, %v1515_v39 }
 0xc42   : >> { %2614 = vpow2.f32 %v1521_v40 }
 0xc43   : >> { %2616 = vpow2.f32 %v1519_v42 }
 0xc4b   : >> { %v2613_v43 = vpop.eup %2612 }
 0xc4c   : >> { %v1523_v44 = vsel %vm1005_vm4, %v2613_v43, 0.0 }
 0xc4d   : >> { %1524 = vadd.xlane.f32.xlu0 %v1523_v44 }
 0xc4f   : >> { %v2615_v45 = vpop.eup %2614 }
 0xc50   : >> { %v2617_v47 = vpop.eup %2616  ;;  %v1529_v48 = vsel %vm1012_vm5, %v2615_v45, 0.0 }
 0xc51   : >> { %1530 = vadd.xlane.f32.xlu1 %v1529_v48  ;;  %v1526_v50 = vsel %vm1005_vm4, %v2617_v47, 0.0 }
 0xc52   : >> { %1527 = vadd.xlane.f32.xlu0 %v1526_v50 }
 0xc62   : >> { %1540 = vrot.lane.b32.xlu1 %v3007_v46, %s2751_s26 }
 0xc66   : >> { %2546 = vrot.lane.b32.xlu1 %v2545_v26, %s2752_s27 }
 0xc68   : >> { %1542 = vrot.lane.b32.xlu0 %v3004_v41, %s2751_s26 }
 0xc6a   : >> { %1609 = vrot.lane.b32.xlu1 %v3068_v22, %s2752_s27  ;;  %s1726_s27 = scalar_lea.vmem %s3262_s10, %s2738_s28 }
 0xc6b   : >> { %v2230_v32 = vld [vmem:[%s1726_s27] ss:$0 sm:$0xff]  ;;  %s1739_s27 = scalar_lea.vmem %s3264_s12, %s2738_s28 }
 0xc6c   : >> { %2551 = vrot.lane.b32.xlu0 %v2550_v18, %s2753_s3 }
 0xc6e   : >> { %1621 = vrot.lane.b32.xlu1 %v2383_v13, %s2753_s3  ;;  %s2260_s3 = sshll.u32 %s2738_s28, 5 }
 0xc6f   : >> { %s1908_s1 = scalar_lea.vmem %s3267_s15, %s2260_s3  ;;  %s1999_s3 = scalar_lea.vmem %s3268_s16, %s2738_s28 }
 0xcd6   : >> { %v1525_v51 = vpop.xlane.xlu0 %1524 }
 0xcd7   : >> { %2618 = vrcp.f32 %v1525_v51 }
 0xcda   : >> { %v1531_v52 = vpop.xlane.xlu1 %1530 }
 0xcdb   : >> { %v1528_v53 = vpop.xlane.xlu0 %1527  ;;  %2620 = vrcp.f32 %v1531_v52 }
 0xcdc   : >> { %2622 = vrcp.f32 %v1528_v53 }
 0xcde   : >> { %v1541_v23 = vpop.permute.xlu1 %1540 }
 0xcdf   : >> { %v1543_v56 = vpop.permute.xlu0 %1542 }
 0xce0   : >> { %v1552_v46 = vand.u32 %v1543_v56, %v3030_v14  ;;  %v2562_v14 = vld [vmem:[%s1652_s30 + $0x8] sm:$0xff]  }
 0xce2   : >> { %2393 = vmatprep.subr.bf16.mxu1 %v1552_v46  ;;  %v2547_v3 = vpop.permute.xlu1 %2546 }
 0xce3   : >> { %2394 = vmatpush3.bf16.msra.mxu1 %v1552_v46  ;;  %v2552_v5 = vpop.permute.xlu0 %2551  ;;  %v2549_v6 = vunpack.i.h.bf16 %v2547_v3  ;;  %v2548_v7 = vunpack.i.l.bf16 %v2547_v3 }
 0xce4   : >> { %2395 = vmatprep.subr.bf16.mxu1 %v1541_v23  ;;  %v2619_v41 = vpop.eup %2618  ;;  %v2554_v9 = vunpack.i.h.bf16 %v2552_v5  ;;  %v2553_v10 = vunpack.i.l.bf16 %v2552_v5 }
 0xce5   : >> { %v1535_v57 = vmul.f32 %v2619_v41, %v2613_v43  ;;  %v1639_v11 = vsel %vm944_vm3, %v3045_v37, %v2549_v6  ;;  %v1638_v12 = vsel %vm944_vm3, %v3043_v35, %v2548_v7 }
 0xce6   : >> { %v1610_v4 = vpop.permute.xlu1 %1609  ;;  %v1642_v20 = vsel %vm1641_vm7, %v1638_v12, %v2553_v10  ;;  %v1643_v21 = vsel %vm1641_vm7, %v1639_v11, %v2554_v9  ;;  %v2232_v9 = vld [vmem:[%s1739_s27] ss:$0 sm:$0xff] }
 0xce7   : >> { %2396 = vmatpush3.bf16.msra.mxu1 %v1541_v23  ;;  %v1640_v15 = vsel %vm944_vm3, %v3041_v34, %v1610_v4 }
 0xce8   : >> { %v2621_v22 = vpop.eup %2620  ;;  %2401 = vmatprep.subr.bf16.mxu1 %v2562_v14 }
 0xce9   : >> { %v2623_v25 = vpop.eup %2622  ;;  %v1537_v26 = vmul.f32 %v2621_v22, %v2615_v45 }
 0xcea   : >> { %v1536_v58 = vmul.f32 %v2623_v25, %v2617_v47  ;;  %v1622_v8 = vpop.permute.xlu1 %1621 }
 0xceb   : >> { %v1539_v59 = vpack.c.bf16 %v1537_v26, %v1537_v26  ;;  %v1644_v17 = vsel %vm1641_vm7, %v1640_v15, %v1622_v8  ;;  %v2564_v26 = vld [vmem:[%s1801_s29 + $0x8] sm:$0xff]  }
 0xcec   : >> { %v1538_v60 = vpack.c.bf16 %v1536_v58, %v1535_v57  ;;  %v2565_v57 = vld [vmem:[%s1801_s29] sm:$0xff]   ;;  %2409 = vmatprep.subr.bf16.mxu0 %v2564_v26 }
 0xced   : >> { %2410 = vmatpush3.bf16.msra.mxu0 %v2564_v26 }
 0xcee   : >> { %2397 = vmatprep.mubr.msk.bf16.mxu1 %vm1005_vm4, %v1538_v60  ;;  %2411 = vmatprep.subr.bf16.mxu0 %v2565_v57 }
 0xcef   : >> { %2398 = vmatmul.mubr.msk.bf16.vlgmr.msra.gmra.mxu1 %vm1005_vm4, %v1539_v59 }
 0xcf0   : >> { %2402 = vmatpush3.bf16.msra.mxu1 %v2562_v14 }
 0xcf1   : >> { %2403 = vmatprep.subr.bf16.mxu1 %v2563_v61  ;;  %2412 = vmatpush3.bf16.msra.mxu0 %v2565_v57 }
 0xcf4   : >> { %2404 = vmatpush3.bf16.msra.mxu1 %v2563_v61 }
 0xdaf   : >> { %v2399_v62 = vpop.f32.mrf.mxu1 }
 0xdb0   : >> { %1633 = vrot.lane.b32.xlu1 %v2399_v62, %s2754_s0 }
 0xdb1   : >> { %v1588_v63 = vpop.f32.mrf.mxu1 }
 0xdb3   : >> { %v2400_v0 = vpop.f32.mrf.mxu1 }
 0xdb5   : >> { %v1591_v1 = vpop.f32.mrf.mxu1 }
 0xdb6   : >> { %v2555_v2 = vpack.i.bf16 %v1591_v1, %v1588_v63 }
 0xdb8   : >> { %2556 = vrot.lane.b32.xlu0 %v2555_v2, %s2754_s0  ;;  %s1737_s0 = scalar_lea.vmem %s3263_s11, %s2738_s28  ;;  %s788_s28 = sadd.s32 1, %s2738_s28  }
 0xdb9   : >> { %v2231_v4 = vld [vmem:[%s1737_s0] ss:$0 sm:$0xff]  ;;  %p785_p11 = scmp.ge.s32.totalorder %s788_s28, 2  }
 0xdba   : > { %vm2756_vm10 = vmmov (%p785_p11), 0   ;;  %s2254_s27 = sshll.u32 (%p785_p11), %s2884_s2, 4  ;;  %s3306_s28 = sld [smem:[#allocation17_spill]] (%p785_p11) }
 0xdbb   : > { %s3307_s30 = sand.u32 (%p785_p11), 1, %s2714_s22   ;;  %s2757_s2 = smov (%p785_p11), [#allocation2]  }
 0xdbc   : > { %s2089_s0 = scalar_lea.sflag (%p785_p11), [#allocation3], %s3307_s30  ;;  %s2650_s26 = sshll.u32 (%p785_p11), %s2757_s2, 4  ;;  %s2651_s26 = int_to_ptr.vmem [resolvable:$false] %s2650_s26 }
 0xe22   : >> { %v1634_v13 = vpop.permute.xlu1 %1633 }
 0xe23   : >> { %v1648_v24 = vsel %vm1645_vm8, %v1644_v17, %v1634_v13 }
 0xe24   : >> { %v1650_v29 = vpack.c.bf16 %v1648_v24, %v1648_v24  ;;  %v2569_v24 = vld [vmem:[%s1908_s1] sm:$0xff]  }
 0xe2a   : >> { %v2557_v16 = vpop.permute.xlu0 %2556 }
 0xe2b   : >> { %v2559_v18 = vunpack.i.h.bf16 %v2557_v16  ;;  %v2558_v19 = vunpack.i.l.bf16 %v2557_v16 }
 0xe2d   : >> { %v1646_v27 = vsel %vm1645_vm8, %v1642_v20, %v2558_v19  ;;  %v1647_v28 = vsel %vm1645_vm8, %v1643_v21, %v2559_v18  ;;  %v2566_v19 = vld [vmem:[%s1908_s1 + $0x18] sm:$0xff]   ;;  %v2567_v20 = vld [vmem:[%s1908_s1 + $0x10] sm:$0xff]   ;;  %v2568_v21 = vld [vmem:[%s1908_s1 + $0x8] sm:$0xff]   ;;  %s3207_s1 = scalar_lea.hbm (%p785_p11), %s3306_s28, %s2254_s27  ;;  %s2652_s27 = scalar_lea.vmem (%p785_p11), %s2651_s26, 32 }
 0xe2e   : >> { %v1649_v37 = vpack.c.bf16 %v1647_v28, %v1646_v27  ;;  %2417 = vmatprep.subr.bf16.mxu1 %v2566_v19  ;;  %v2234_v27 = vld [vmem:[%s1806_s21] ss:$0 sm:$0xff] }
 0xe30   : >> { %2405 = vmatprep.mubr.msk.bf16.mxu1 %vm723_vm2, %v1649_v37 }
 0xe31   : >> { %2406 = vmatmul.mubr.msk.bf16.vlgmr.msra.gmra.mxu1 %vm723_vm2, %v1650_v29 }
 0xe32   : >> { %2418 = vmatpush3.bf16.msra.mxu1 %v2566_v19 }
 0xe33   : >> { %2419 = vmatprep.subr.bf16.mxu1 %v2567_v20 }
 0xe36   : >> { %2420 = vmatpush3.bf16.msra.mxu1 %v2567_v20 }
 0xe37   : >> { %2421 = vmatprep.subr.bf16.mxu1 %v2568_v21 }
 0xe3a   : >> { %2422 = vmatpush3.bf16.msra.mxu1 %v2568_v21 }
 0xe3b   : >> { %2423 = vmatprep.subr.bf16.mxu1 %v2569_v24 }
 0xe3e   : >> { %2424 = vmatpush3.bf16.msra.mxu1 %v2569_v24 }
 0xef1   : >> { %v2407_v35 = vpop.f32.mrf.mxu1 }
 0xef2   : >> { %v1725_v30 = vadd.f32 %v2726_v54, %v2407_v35 }
 0xef3   : >> { %v1709_v34 = vpop.f32.mrf.mxu1 }
 0xef4   : >> { %v1723_v31 = vadd.f32 %v2734_v49, %v1709_v34  ;;  %v3132_v39 = vadd.f32 %v2230_v32, %v1725_v30 }
 0xef5   : >> { %v2408_v33 = vpop.f32.mrf.mxu1 }
 0xef6   : >> { %v3130_v36 = vadd.f32 %v2230_v32, %v1723_v31  ;;  %v1747_v54 = vsel %vm730_vm1, %v3132_v39, 0.0 }
 0xef7   : >> { %v1712_v38 = vpop.f32.mrf.mxu1 }
 0xef8   : >> { %v1724_v40 = vadd.f32 %v2730_v55, %v1712_v38  ;;  %v1741_v42 = vsel %vm723_vm2, %v3130_v36, 0.0 }
 0xef9   : >> { %1742 = vadd.xlane.f32.xlu0 %v1741_v42 }
 0xefa   : >> { %v3137_v43 = vadd.f32 %v2230_v32, %v1724_v40 }
 0xefc   : >> { %v1744_v49 = vsel %vm723_vm2, %v3137_v43, 0.0 }
 0xefd   : >> { %1748 = vadd.xlane.f32.xlu0 %v1747_v54  ;;  %1745 = vadd.xlane.f32.xlu1 %v1744_v49 }
 0xf82   : >> { %v1743_v44 = vpop.xlane.xlu0 %1742 }
 0xf83   : >> { %v1750_v45 = vmul.f32 0.03125, %v1743_v44 }
 0xf85   : >> { %v1753_v47 = vsub.f32 %v3130_v36, %v1750_v45 }
 0xf86   : >> { %v1749_v55 = vpop.xlane.xlu0 %1748  ;;  %v1746_v48 = vpop.xlane.xlu1 %1745 }
 0xf87   : >> { %v1752_v50 = vmul.f32 0.03125, %v1749_v55  ;;  %v1751_v51 = vmul.f32 0.03125, %v1746_v48  ;;  %v1756_v52 = vmul.f32 %v1753_v47, %v1753_v47 }
 0xf89   : >> { %v1755_v53 = vsub.f32 %v3132_v39, %v1752_v50  ;;  %v1754_v56 = vsub.f32 %v3137_v43, %v1751_v51  ;;  %v1759_v46 = vsel %vm723_vm2, %v1756_v52, 0.0 }
 0xf8a   : >> { %1760 = vadd.xlane.f32.xlu0 %v1759_v46 }
 0xf8b   : >> { %v1758_v23 = vmul.f32 %v1755_v53, %v1755_v53  ;;  %v1757_v41 = vmul.f32 %v1754_v56, %v1754_v56 }
 0xf8d   : >> { %v1765_v22 = vsel %vm730_vm1, %v1758_v23, 0.0  ;;  %v1762_v25 = vsel %vm723_vm2, %v1757_v41, 0.0 }
 0xf8e   : >> { %1766 = vadd.xlane.f32.xlu1 %v1765_v22  ;;  %1763 = vadd.xlane.f32.xlu0 %v1762_v25  ;;  %v2250_v25 = vld [vmem:[%s1999_s3] ss:$0 sm:$0xff]  ;;  %s2101_s3 = sshll.u32 (%p785_p11), %s2949_s23, 4  ;;  %s3209_s3 = int_to_ptr.vmem [resolvable:$true] %s2101_s3 }
 0xf8f   : > { %s2646_s21 = scalar_lea.vmem (%p785_p11), %s3209_s3, 16  ;;  %p2653_p1 = scmp.lt.s32.totalorder (%p785_p11), %s3209_s3, %s2651_s26 }
 0xf90   : > { %p2647_p12 = scmp.ne.s32.totalorder (%p785_p11), %s3209_s3, %s2646_s21  ;;  %p2654_p2 = scmp.lt.s32.totalorder (%p785_p11), %s2652_s27, %s2646_s21 }
 0xf92   : > { %p2648_p13 = pnand (%p785_p11), %p2647_p12, %p2901_p5  ;;  %p2655_p3 = por (%p785_p11), %p2654_p2, %p2653_p1 }
 0xf94   : > { %p2649_p0 = pneg (%p785_p11), %p2648_p13 }
 0xf96   : > { %p2656_p4 = pnand (%p785_p11), %p2655_p3, %p2649_p0 }
0x1013   : >> { %v1761_v58 = vpop.xlane.xlu0 %1760 }
0x1014   : >> { %v1768_v59 = vmul.f32 0.03125, %v1761_v58 }
0x1016   : >> { %v1771_v60 = vadd.f32 1e-05, %v1768_v59 }
0x1017   : >> { %v1764_v14 = vpop.xlane.xlu0 %1763  ;;  %v1767_v61 = vpop.xlane.xlu1 %1766 }
0x1018   : >> { %2624 = vrsqrt.f32 %v1771_v60  ;;  %v1769_v62 = vmul.f32 0.03125, %v1764_v14  ;;  %v1770_v63 = vmul.f32 0.03125, %v1767_v61 }
0x101a   : >> { %v1772_v0 = vadd.f32 1e-05, %v1769_v62  ;;  %v1773_v1 = vadd.f32 1e-05, %v1770_v63 }
0x101c   : >> { %2626 = vrsqrt.f32 %v1772_v0 }
0x101d   : >> { %2628 = vrsqrt.f32 %v1773_v1  ;;  %v2642_v1 = vld [vmem:[%s3271_s19 + $0x8] sm:$0xff] (%p785_p11)  }
0x1025   : >> { %v2625_v2 = vpop.eup %2624 }
0x1026   : >> { %v1777_v3 = vmul.f32 %v2625_v2, %v1753_v47  ;;  %v2755_v2 = vmov (%p785_p11), 0.0  }
0x1027   : > { %2429 = vmatprep.subr.bf16.mxu0 (%p785_p11), %v2755_v2 }
0x1028   : >> { %v1786_v8 = vmul.f32 %v2231_v4, %v1777_v3  ;;  %v2643_v3 = vld [vmem:[%s3271_s19] sm:$0xff] (%p785_p11)  }
0x1029   : >> { %v2627_v5 = vpop.eup %2626 }
0x102a   : >> { %v2629_v6 = vpop.eup %2628  ;;  %v1778_v7 = vmul.f32 %v2627_v5, %v1754_v56  ;;  %v1795_v13 = vadd.f32 %v2232_v9, %v1786_v8  ;;  %v2010_v8 = vld [vmem:[%s3269_s17] sm:$0x1] (%p785_p11) }
0x102b   : >> { %v1779_v10 = vmul.f32 %v2629_v6, %v1755_v53 }
0x102c   : >> { %v1787_v11 = vmul.f32 %v2231_v4, %v1778_v7 }
0x102d   : >> { %v1788_v12 = vmul.f32 %v2231_v4, %v1779_v10  ;;  %v2011_v10 = vld [vmem:[%s3270_s18] sm:$0x1] (%p785_p11) }
0x102e   : >> { %v1796_v15 = vadd.f32 %v2232_v9, %v1787_v11 }
0x102f   : >> { %v1797_v16 = vadd.f32 %v2232_v9, %v1788_v12 }
0x1030   : >> { %v1798_v17 = vpack.c.bf16 %v1796_v15, %v1795_v13 }
0x1031   : >> { %v1799_v18 = vpack.c.bf16 %v1797_v16, %v1797_v16 }
0x1032   : >> { %2413 = vmatprep.mubr.msk.bf16.mxu0 %vm723_vm2, %v1798_v17 }
0x1033   : >> { %2414 = vmatmul.mubr.msk.bf16.vlgmr.msra.gmra.mxu0 %vm723_vm2, %v1799_v18 }
0x1034   : > { %2433 = vmatprep.mubr.msk.bf16.mxu0 (%p785_p11), %vm2756_vm10, %v2755_v2  ;;  %2430 = vmatpush3.bf16.msra.mxu0 (%p785_p11), %v2642_v1 }
0x1035   : > { %2431 = vmatprep.subr.bf16.mxu0 (%p785_p11), %v2755_v2 }
0x1038   : > { %2432 = vmatpush3.bf16.msra.mxu0 (%p785_p11), %v2643_v3 }
0x10f3   : >> { %v2415_v28 = vpop.f32.mrf.mxu0 }
0x10f4   : >> { %v1875_v37 = vadd.f32 %v2415_v28, %v2234_v27 }
0x10f5   : >> { %v1866_v29 = vpop.f32.mrf.mxu0 }
0x10f6   : >> { %v2241_v35 = vmul.f32 -1.702, %v1875_v37  ;;  %v1867_v34 = vadd.f32 %v2234_v27, %v1866_v29 }
0x10f7   : >> { %v2416_v30 = vpop.f32.mrf.mxu0 }
0x10f8   : >> { %v1890_v31 = vmul.f32 1.442695, %v2241_v35  ;;  %v2239_v32 = vmul.f32 -1.702, %v1867_v34 }
0x10f9   : >> { %v1869_v33 = vpop.f32.mrf.mxu0 }
0x10fa   : >> { %2630 = vpow2.f32 %v1890_v31  ;;  %v1886_v38 = vmul.f32 1.442695, %v2239_v32  ;;  %v1870_v40 = vadd.f32 %v2234_v27, %v1869_v33 }
0x10fc   : >> { %2632 = vpow2.f32 %v1886_v38  ;;  %v2240_v42 = vmul.f32 -1.702, %v1870_v40 }
0x10fe   : >> { %v1888_v54 = vmul.f32 1.442695, %v2240_v42 }
0x1100   : >> { %2634 = vpow2.f32 %v1888_v54 }
0x1107   : >> { %v2631_v49 = vpop.eup %2630 }
0x1108   : >> { %v1894_v45 = vadd.f32 1.0, %v2631_v49 }
0x1109   : >> { %v2633_v44 = vpop.eup %2632 }
0x110a   : >> { %v1892_v47 = vadd.f32 1.0, %v2633_v44  ;;  %2636 = vrcp.f32 %v1894_v45 }
0x110c   : >> { %2638 = vrcp.f32 %v1892_v47 }
0x110d   : >> { %v2635_v55 = vpop.eup %2634 }
0x110e   : >> { %v1893_v48 = vadd.f32 1.0, %v2635_v55 }
0x1110   : >> { %2640 = vrcp.f32 %v1893_v48 }
0x1117   : >> { %v2637_v50 = vpop.eup %2636 }
0x1118   : >> { %v1903_v53 = vmul.f32 %v2637_v50, %v1875_v37 }
0x1119   : >> { %v2639_v51 = vpop.eup %2638 }
0x111a   : >> { %v1901_v56 = vmul.f32 %v2639_v51, %v1867_v34  ;;  %v1905_v41 = vpack.c.bf16 %v1903_v53, %v1903_v53 }
0x111d   : >> { %v2641_v52 = vpop.eup %2640 }
0x111e   : >> { %v1902_v46 = vmul.f32 %v2641_v52, %v1870_v40 }
0x1120   : >> { %v1904_v23 = vpack.c.bf16 %v1902_v46, %v1901_v56 }
0x1122   : >> { %2425 = vmatprep.mubr.msk.bf16.mxu1 %vm1941_vm9, %v1904_v23 }
0x1123   : >> { %2426 = vmatmul.mubr.msk.bf16.vlgmr.msra.gmra.mxu1 %vm1941_vm9, %v1905_v41 }
0x11e3   : >> { %v2427_v22 = vpop.f32.mrf.mxu1 }
0x11e4   : >> { %v1998_v26 = vadd.f32 %v2427_v22, %v3132_v39 }
0x11e5   : >> { %v1982_v57 = vpop.f32.mrf.mxu1 }
0x11e6   : >> { %v2009_v54 = vadd.f32 %v2250_v25, %v1998_v26   ;;  %v1996_v58 = vadd.f32 %v1982_v57, %v3130_v36 }
0x11e7   : >> { %v2428_v59 = vpop.f32.mrf.mxu1 }
0x11e8   : >> { %v2007_v60 = vadd.f32 %v2250_v25, %v1996_v58   ;;  %787 = sbr.rel (!%p785_p11) target bundleno = 553 (0x229), region = 154 }
0x11e9   : >> { %v1985_v14 = vpop.f32.mrf.mxu1 }
0x11ea   : >> { %v1997_v61 = vadd.f32 %v1985_v14, %v3137_v43  ;;  %v3305_v49 = vmov %v2007_v60  ;;  %v2012_v36 = vsel (%p785_p11), %vm730_vm1, %v2007_v60, 0.0 }
0x11eb   : > { %2013 = vadd.xlane.f32.xlu0 (%p785_p11), %v2012_v36 }
0x11ec   : >> { %v2008_v55 = vadd.f32 %v2250_v25, %v1997_v61  }
0x1274   : > { %v2014_v39 = vpop.xlane.xlu0 %2013 }
0x1275   : > { %v2015_v62 = vmul.f32 0.03125, %v2014_v39 }
0x1277   : > { %v2016_v63 = vsub.f32 %v2007_v60, %v2015_v62 }
0x1279   : > { %v2017_v43 = vmul.f32 %v2016_v63, %v2016_v63 }
0x127b   : > { %v2018_v0 = vsel %vm730_vm1, %v2017_v43, 0.0 }
0x127c   : > { %2019 = vadd.xlane.f32.xlu0 %v2018_v0 }
0x1305   : > { %v2020_v4 = vpop.xlane.xlu0 %2019 }
0x1306   : > { %v2021_v5 = vmul.f32 0.03125, %v2020_v4 }
0x1308   : > { %v2022_v6 = vadd.f32 1e-05, %v2021_v5 }
0x130a   : > { %2644 = vrsqrt.f32 %v2022_v6 }
0x1317   : > { %v2645_v7 = vpop.eup %2644 }
0x1318   : > { %v2024_v9 = vmul.f32 %v2645_v7, %v2016_v63 }
0x131a   : > { %v2025_v11 = vmul.f32 %v2024_v9, %v2010_v8 }
0x131c   : > { %v2026_v12 = vadd.f32 %v2025_v11, %v2011_v10 }
0x131e   : > { %v2027_v13 = vpack.c.bf16 %v2026_v12, %v2026_v12 }
0x1320   : > { %2434 = vmatmul.mubr.msk.bf16.vlgmr.msra.gmra.mxu0 %vm723_vm2, %v2027_v13 }
0x13e0   : > { %v2081_v15 = vpop.f32.mrf.mxu0 }
0x13e1   : > { %2087 = vst.msk [vmem:[%s2949_s23] sm:$0x1] %vm730_vm1, %v2081_v15 }
0x13e2   : > { %v2435_v16 = vpop.f32.mrf.mxu0 }
0x13e3   : > { %2659 = shalt.err (!%p2656_p4)
}
0x13e4   : > { %s2660_s23 = scalar_lea.hbm %s3207_s1, 16  ;;  %s2664_s30 = scalar_lea.hbm %s3306_s28, 32 }
0x13e5   : > { %p2661_p7 = scmp.ne.s32.totalorder %s3207_s1, %s2660_s23  ;;  %p2665_p10 = scmp.lt.s32.totalorder %s3207_s1, %s3306_s28 }
0x13e6   : > { %p2666_p11 = scmp.lt.s32.totalorder %s2664_s30, %s2660_s23 }
0x13e7   : > { %p2662_p8 = pnand %p2661_p7, %p2901_p5 }
0x13e8   : > { %p2667_p12 = por %p2666_p11, %p2665_p10 }
0x13e9   : > { %p2663_p9 = pneg %p2662_p8 }
0x13eb   : > { %p2668_p13 = pnand %p2667_p12, %p2663_p9 }
0x13ed   : > { %2671 = shalt.err (!%p2668_p13)
}
0x13ee   : > { %2446 = dma.vmem_to_hbm [thread:$0]  (%p2901_p5), %s3209_s3, 16, %s3207_s1, %s2089_s0   ;;  %v2084_v17 = vpop.f32.mrf.mxu0 }
0x13f0   : > { %v2436_v18 = vpop.f32.mrf.mxu0 }
0x13f1 PF: > { %s3308_s21 = sld [smem:[#allocation7_spill]] }
0x13f2   : > { %s3309_s26 = sld [smem:[#allocation5_spill]] }
0x13f7   : > { %p2452_p0 = scmp.ge.s32.totalorder %s3308_s21, 2 }
0x13f8   : > { %s2113_s24 = sand.u32 1, %s3309_s26  }
0x13f9   : > { %p2449_p1 = pnand %p2452_p0, %p2905_p6  ;;  %s2114_s5 = scalar_lea.sflag [#allocation3], %s2113_s24 }
0x13fb   : > { %p2450_p2 = pneg %p2449_p1 }
0x13fd   : > { %2705 = dma.done.wait (%p2450_p2), %s2114_s5, 16  }
0x13fe   : > { %2707 = vsyncadd (%p2450_p2), %s2114_s5, 4294967280  ;;  %s3311_s24 = sld [smem:[#allocation8_spill]]  ;;  %s3314_s1 = smov %s2714_s22 }
0x13ff   : > { %s3312_s4 = sld [smem:[#allocation6_spill]] }
0x1400   : > { %s3313_s23 = sld [smem:[#allocation9_spill]] }
0x1404   : > { %p30_p5 = scmp.ge.s32.totalorder %s3311_s24, 4  }
0x1405   : > { %s3315_s22 = smov %s3312_s4 }
0x1406   :  { %32 = sbr.rel (!%p30_p5) target bundleno = 11 (0xb), region = 165 }
0x140b   :  { %2118 = vsyncpa [#allocation3], 1 }
0x140c   :  { %2120 = vsyncpa [#allocation3 + $0x1], 1 }

</bundles_post_ra>
